<compile_context>
chip_gen: v7x
topology: tpu7x:2x2x1
jax: 0.10.0
libtpu: 0.0.40
codegen_flags: <defaults>
</compile_context>

<pallas_src>
import functools

import jax
import jax.numpy as jnp
from jax import lax
from jax.experimental import pallas as pl
from jax.experimental.pallas import tpu as pltpu


# The 8 halo taps of a 3x3 'same' conv (center tap (1,1) is handled by a
# separate dense GEMM). Order is shared by the kernel, the weight layout and
# the precomputed mask layout.
_HALO_TAPS = tuple((dy, dx) for dy in range(3) for dx in range(3)
                   if (dy, dx) != (1, 1))


def _basic_block_kernel(x_ref, w1c_ref, w1h_ref, w2c_ref, w2h_ref, bias_ref,
                        mask_ref, o_ref, slab_ref, act_ref, *, H, W):
    """One grid step: `bt` images, full spatial extent, channel-major layout.

    Block shapes (static):
      x_ref    : (bt, C, H*W)   f32        input (also the residual identity)
      w1c/w2c  : (C, C)         mxu dtype  center-tap weights, BN scale folded
      w1h/w2h  : (C, 8*C)       mxu dtype  halo-tap weights,   BN scale folded
      bias_ref : (2, C, 1)      f32        [bn1 bias ; bn2 bias]
      mask_ref : (8*C, H*W)     mxu dtype  precomputed 0/1 halo masks per tap
      o_ref    : (bt, C, H*W)   f32
      slab_ref : (8*C, bt*H*W)  mxu dtype  halo im2col slab (reused, both convs)
      act_ref  : (C,   bt*H*W)  mxu dtype  staged source / conv1 activation
    """
    bt, C, HW = x_ref.shape
    mxu_dtype = slab_ref.dtype

    def fill_halo_slab():
        # For halo tap t and image b, rows t*C:(t+1)*C / cols b*HW:(b+1)*HW of
        # the slab hold act shifted by (dy-1, dx-1), with out-of-image lanes
        # zeroed via the precomputed multiplicative mask (no mask arithmetic).
        for b in range(bt):
            src = act_ref[:, b * HW:(b + 1) * HW]
            for t, (dy, dx) in enumerate(_HALO_TAPS):
                delta = (dy - 1) * W + (dx - 1)
                rolled = pltpu.roll(src, shift=(-delta) % HW, axis=1)
                slab_ref[t * C:(t + 1) * C, b * HW:(b + 1) * HW] = (
                    rolled * mask_ref[t * C:(t + 1) * C, :])

    # ---- Phase 0: stage the conv1 source in MXU dtype --------------------
    for b in range(bt):
        act_ref[:, b * HW:(b + 1) * HW] = x_ref[b].astype(mxu_dtype)

    # ---- Phase 1: conv1 halo slab -----------------------------------------
    fill_halo_slab()

    # ---- Phase 2: conv1 = halo GEMM + center GEMM, bias, relu (per image) --
    b1 = bias_ref[0]                                           # (C, 1) f32
    for b in range(bt):
        acc = jnp.dot(w1h_ref[...], slab_ref[:, b * HW:(b + 1) * HW],
                      preferred_element_type=jnp.float32)
        acc = acc + jnp.dot(w1c_ref[...], act_ref[:, b * HW:(b + 1) * HW],
                            preferred_element_type=jnp.float32)
        act_ref[:, b * HW:(b + 1) * HW] = jnp.maximum(acc + b1,
                                                      0.0).astype(mxu_dtype)

    # ---- Phase 3: conv2 halo slab (from the staged conv1 activation) ------
    fill_halo_slab()

    # ---- Phase 4: conv2, bias, residual add, relu, store (per image) ------
    b2 = bias_ref[1]                                           # (C, 1) f32
    for b in range(bt):
        acc = jnp.dot(w2h_ref[...], slab_ref[:, b * HW:(b + 1) * HW],
                      preferred_element_type=jnp.float32)
        acc = acc + jnp.dot(w2c_ref[...], act_ref[:, b * HW:(b + 1) * HW],
                            preferred_element_type=jnp.float32)
        res = acc + b2 + x_ref[b]
        o_ref[b] = jnp.maximum(res, 0.0).astype(o_ref.dtype)


def _auto_batch_tile(N):
    # Largest bt <= 4 dividing N while keeping >= 2 grid steps (v7x has two
    # TensorCores; a 1-step grid would idle half the chip). On 1-TC v5e/v6e a
    # larger bt may be passed explicitly to amortize per-step overhead.
    best = 1
    for bt in range(1, min(4, N) + 1):
        if N % bt == 0 and (N // bt >= 2 or N == 1):
            best = bt
    return best


def basic_block_pallas(x_nchw, w1, g1, be1, m1, v1, w2, g2, be2, m2, v2, *,
                       eps=1e-5, batch_tile=None, mxu_dtype=jnp.bfloat16,
                       vmem_limit_bytes=None):
    """x_nchw: (N, C, H, W) float32 (PyTorch layout). Returns (N, C, H, W)."""
    N, Cin, H, W = x_nchw.shape
    Cout = w1.shape[0]
    assert Cin == Cout, "stride=1 BasicBlock with downsample=None needs Cin==Cout"
    C, HW = Cin, H * W

    itemsize = jnp.dtype(mxu_dtype).itemsize
    sub = 16 if itemsize == 2 else 8
    assert C % sub == 0, f"channels must be a multiple of {sub} for {mxu_dtype}"
    assert HW % 128 == 0, "H*W must be a multiple of 128 (lane tiling)"

    bt = _auto_batch_tile(N) if batch_tile is None else batch_tile
    assert N % bt == 0

    # Channel-major, spatial-flattened: a free reshape of native NCHW.
    x_flat = x_nchw.reshape(N, C, HW).astype(jnp.float32)

    # Fold eval-mode BN scale into the conv weights (per output-channel row);
    # keep only the per-channel biases for the in-kernel epilogue.
    inv1 = g1 / jnp.sqrt(v1 + eps)
    inv2 = g2 / jnp.sqrt(v2 + eps)
    bias = jnp.stack([be1 - m1 * inv1, be2 - m2 * inv2]
                     ).reshape(2, C, 1).astype(jnp.float32)

    def prep_w(w, inv):
        # (Cout, Cin, 3, 3) -> scaled, split into center (C,C) + halo (C,8C).
        wt = (jnp.transpose(w, (0, 2, 3, 1)) *
              inv[:, None, None, None]).astype(jnp.float32)   # (C, 3, 3, C)
        wc = wt[:, 1, 1, :].astype(mxu_dtype)
        wh = jnp.concatenate([wt[:, dy, dx, :] for (dy, dx) in _HALO_TAPS],
                             axis=1).astype(mxu_dtype)        # (C, 8C)
        return wc, wh

    w1c, w1h = prep_w(w1, inv1)
    w2c, w2h = prep_w(w2, inv2)

    # Precomputed multiplicative halo masks: row block t*C:(t+1)*C is the 0/1
    # validity of tap t over the flattened spatial axis (kernel does no mask
    # arithmetic at all).
    lane = jnp.arange(HW, dtype=jnp.int32)
    py, px = lane // W, lane % W
    mask_rows = []
    for (dy, dx) in _HALO_TAPS:
        valid = ((py + dy - 1 >= 0) & (py + dy - 1 < H) &
                 (px + dx - 1 >= 0) & (px + dx - 1 < W))
        mask_rows.append(jnp.broadcast_to(valid.astype(mxu_dtype)[None, :],
                                          (C, HW)))
    mask = jnp.concatenate(mask_rows, axis=0)                  # (8C, HW)

    # VMEM budget (per grid step) -> explicit limit with headroom.
    blk_io = bt * C * HW * 4
    weights_b = 2 * 9 * C * C * itemsize
    mask_b = 8 * C * HW * itemsize
    bias_b = 2 * C * 128 * 4
    scratch_b = (8 * C + C) * bt * HW * itemsize
    est = 2 * (2 * blk_io) + 2 * (weights_b + mask_b + bias_b) + scratch_b
    if vmem_limit_bytes is None:
        vmem_limit_bytes = max(32 << 20, min(int(2 * est), 48 << 20))

    flops = 2 * 2 * 9 * N * HW * C * C
    bytes_accessed = (x_flat.size * 4 + N * C * HW * 4
                      + 2 * (weights_b + mask_b) + bias.size * 4)

    kernel = functools.partial(_basic_block_kernel, H=H, W=W)

    out = pl.pallas_call(
        kernel,
        out_shape=jax.ShapeDtypeStruct((N, C, HW), jnp.float32),
        grid_spec=pltpu.PrefetchScalarGridSpec(
            num_scalar_prefetch=0,
            grid=(N // bt,),
            in_specs=[
                pl.BlockSpec((bt, C, HW), lambda n: (n, 0, 0)),
                pl.BlockSpec((C, C), lambda n: (0, 0)),
                pl.BlockSpec((C, 8 * C), lambda n: (0, 0)),
                pl.BlockSpec((C, C), lambda n: (0, 0)),
                pl.BlockSpec((C, 8 * C), lambda n: (0, 0)),
                pl.BlockSpec((2, C, 1), lambda n: (0, 0, 0)),
                pl.BlockSpec((8 * C, HW), lambda n: (0, 0)),
            ],
            out_specs=pl.BlockSpec((bt, C, HW), lambda n: (n, 0, 0)),
            scratch_shapes=[
                pltpu.VMEM((8 * C, bt * HW), mxu_dtype),   # halo im2col slab
                pltpu.VMEM((C, bt * HW), mxu_dtype),       # staged activation
            ],
        ),
        compiler_params=pltpu.CompilerParams(
            dimension_semantics=("parallel",),
            vmem_limit_bytes=int(vmem_limit_bytes)),
        cost_estimate=pl.CostEstimate(
            flops=flops, transcendentals=0, bytes_accessed=bytes_accessed),
    )(x_flat, w1c, w1h, w2c, w2h, bias, mask)

    return out.reshape(N, C, H, W)


def basic_block_reference(x, w1, g1, be1, m1, v1, w2, g2, be2, m2, v2, *,
                          eps=1e-5, conv_dtype=jnp.float32,
                          fold_bn_scale=False):
    """Pure-JAX reference (NCHW), eval-mode PyTorch BasicBlock.

    `conv_dtype` mirrors the kernel's MXU operand dtype (f32 accumulation);
    `fold_bn_scale=True` mirrors the kernel's weight-side BN-scale folding.
    """
    def conv(a, w):
        return lax.conv_general_dilated(
            a.astype(conv_dtype), w.astype(conv_dtype),
            window_strides=(1, 1), padding=((1, 1), (1, 1)),
            dimension_numbers=("NCHW", "OIHW", "NCHW"),
            preferred_element_type=jnp.float32)

    def block(a, w, g, b, m, v):
        inv = g / jnp.sqrt(v + eps)
        shift = (b - m * inv)[None, :, None, None]
        if fold_bn_scale:
            return conv(a, w * inv[:, None, None, None]) + shift
        return conv(a, w) * inv[None, :, None, None] + shift

    out = jax.nn.relu(block(x, w1, g1, be1, m1, v1))
    out = block(out, w2, g2, be2, m2, v2)
    return jax.nn.relu(out + x)


if __name__ == "__main__":
    # Small shapes: batch=2, planes=in_planes=32, spatial=16, stride=1.
    N, C, H, W = 2, 32, 16, 16
    key = jax.random.PRNGKey(0)
    ks = jax.random.split(key, 10)

    x = jax.random.normal(ks[0], (N, C, H, W), jnp.float32)

    w1 = 0.1 * jax.random.normal(ks[1], (C, C, 3, 3), jnp.float32)
    w2 = 0.1 * jax.random.normal(ks[2], (C, C, 3, 3), jnp.float32)
    g1 = 1.0 + 0.1 * jax.random.normal(ks[3], (C,), jnp.float32)
    be1 = 0.1 * jax.random.normal(ks[4], (C,), jnp.float32)
    m1 = 0.1 * jax.random.normal(ks[5], (C,), jnp.float32)
    v1 = 1.0 + 0.5 * jax.random.uniform(ks[6], (C,), jnp.float32)
    g2 = 1.0 + 0.1 * jax.random.normal(ks[7], (C,), jnp.float32)
    be2 = 0.1 * jax.random.normal(ks[8], (C,), jnp.float32)
    m2 = jnp.linspace(-0.2, 0.2, C, dtype=jnp.float32)
    v2 = 1.0 + jnp.linspace(0.0, 0.5, C, dtype=jnp.float32)

    params = (w1, g1, be1, m1, v1, w2, g2, be2, m2, v2)

    ref_f32 = jax.block_until_ready(basic_block_reference(x, *params))
    ref_bf16 = jax.block_until_ready(
        basic_block_reference(x, *params, conv_dtype=jnp.bfloat16,
                              fold_bn_scale=True))

    # 1) f32 MXU operands: algorithm check against the f32 reference.
    out = jax.block_until_ready(
        basic_block_pallas(x, *params, mxu_dtype=jnp.float32))
    assert out.shape == (N, C, H, W)
    assert jnp.allclose(out, ref_f32, atol=2e-3, rtol=2e-3), (
        float(jnp.max(jnp.abs(out - ref_f32))))

    # 2) bf16 MXU operands (default), auto batch_tile (N=2 -> bt=1, grid=2).
    out = jax.block_until_ready(basic_block_pallas(x, *params))
    assert jnp.allclose(out, ref_bf16, atol=2e-3, rtol=2e-3), (
        float(jnp.max(jnp.abs(out - ref_bf16))))
    assert jnp.allclose(out, ref_f32, atol=7.5e-2, rtol=7.5e-2), (
        float(jnp.max(jnp.abs(out - ref_f32))))

    # 3) Larger batch: auto batch_tile = 4 (two grid steps) — exercises the
    #    amortized per-step path with bounded vreg liveness.
    N8 = 8
    x8 = jax.random.normal(ks[9], (N8, C, H, W), jnp.float32)
    ref8 = jax.block_until_ready(
        basic_block_reference(x8, *params, conv_dtype=jnp.bfloat16,
                              fold_bn_scale=True))
    out8 = jax.block_until_ready(basic_block_pallas(x8, *params))
    assert out8.shape == (N8, C, H, W)
    assert jnp.allclose(out8, ref8, atol=2e-3, rtol=2e-3), (
        float(jnp.max(jnp.abs(out8 - ref8))))

    print("KERNEL_OK")
</pallas_src>

<mosaic_0001>
module attributes {stable_mosaic.version = 11 : i64} {
  func.func @_basic_block_kernel(%arg0: i32, %arg1: memref<1x32x256xf32, #tpu.memory_space<vmem>>, %arg2: memref<32x32xf32, #tpu.memory_space<vmem>>, %arg3: memref<32x256xf32, #tpu.memory_space<vmem>>, %arg4: memref<32x32xf32, #tpu.memory_space<vmem>>, %arg5: memref<32x256xf32, #tpu.memory_space<vmem>>, %arg6: memref<2x32x1xf32, #tpu.memory_space<vmem>>, %arg7: memref<256x256xf32, #tpu.memory_space<vmem>>, %arg8: memref<1x32x256xf32, #tpu.memory_space<vmem>>, %arg9: memref<256x256xf32, #tpu.memory_space<vmem>>, %arg10: memref<32x256xf32, #tpu.memory_space<vmem>>) attributes {dimension_semantics = [#tpu.dimension_semantics<parallel>], iteration_bounds = array<i64: 2>, scalar_prefetch = 0 : i64, scratch_operands = 2 : i64, tpu.core_type = #tpu.core_type<tc>, window_params = [{transform_indices = @transform_0, window_bounds = array<i64: 1, 32, 256>}, {pipeline_mode = #tpu.pipeline_mode<synchronous>, transform_indices = @transform_1, window_bounds = array<i64: 32, 32>}, {pipeline_mode = #tpu.pipeline_mode<synchronous>, transform_indices = @transform_2, window_bounds = array<i64: 32, 256>}, {pipeline_mode = #tpu.pipeline_mode<synchronous>, transform_indices = @transform_3, window_bounds = array<i64: 32, 32>}, {pipeline_mode = #tpu.pipeline_mode<synchronous>, transform_indices = @transform_4, window_bounds = array<i64: 32, 256>}, {pipeline_mode = #tpu.pipeline_mode<synchronous>, transform_indices = @transform_5, window_bounds = array<i64: 2, 32, 1>}, {pipeline_mode = #tpu.pipeline_mode<synchronous>, transform_indices = @transform_6, window_bounds = array<i64: 256, 256>}, {transform_indices = @transform_7, window_bounds = array<i64: 1, 32, 256>}]} {
    %c0 = arith.constant 0 : index
    %c0_0 = arith.constant 0 : index
    %c0_1 = arith.constant 0 : index
    %0 = vector.load %arg1[%c0, %c0_0, %c0_1] : memref<1x32x256xf32, #tpu.memory_space<vmem>>, vector<1x32x256xf32>
    %1 = vector.shape_cast %0 : vector<1x32x256xf32> to vector<32x256xf32>
    %c0_2 = arith.constant 0 : index
    %c0_3 = arith.constant 0 : index
    %2 = vector.load %arg10[%c0_2, %c0_3] : memref<32x256xf32, #tpu.memory_space<vmem>>, vector<32x256xf32>
    tpu.vector_store %arg10[%c0_2, %c0_3], %1 {strides = array<i32>} : memref<32x256xf32, #tpu.memory_space<vmem>>, vector<32x256xf32>,
    %c0_4 = arith.constant 0 : index
    %c0_5 = arith.constant 0 : index
    %3 = vector.load %arg10[%c0_4, %c0_5] : memref<32x256xf32, #tpu.memory_space<vmem>>, vector<32x256xf32>
    %c17_i32 = arith.constant 17 : i32
    %4 = tpu.dynamic_rotate %3 by %c17_i32 dim 1 : vector<32x256xf32>, i32 -> vector<32x256xf32>
    %c0_6 = arith.constant 0 : index
    %c0_7 = arith.constant 0 : index
    %5 = vector.load %arg7[%c0_6, %c0_7] : memref<256x256xf32, #tpu.memory_space<vmem>>, vector<32x256xf32>
    %6 = arith.mulf %4, %5 : vector<32x256xf32>
    %c0_8 = arith.constant 0 : index
    %c0_9 = arith.constant 0 : index
    %7 = vector.load %arg9[%c0_8, %c0_9] : memref<256x256xf32, #tpu.memory_space<vmem>>, vector<32x256xf32>
    tpu.vector_store %arg9[%c0_8, %c0_9], %6 {strides = array<i32>} : memref<256x256xf32, #tpu.memory_space<vmem>>, vector<32x256xf32>,
    %c16_i32 = arith.constant 16 : i32
    %8 = tpu.dynamic_rotate %3 by %c16_i32 dim 1 : vector<32x256xf32>, i32 -> vector<32x256xf32>
    %c32 = arith.constant 32 : index
    %c0_10 = arith.constant 0 : index
    %9 = vector.load %arg7[%c32, %c0_10] : memref<256x256xf32, #tpu.memory_space<vmem>>, vector<32x256xf32>
    %10 = arith.mulf %8, %9 : vector<32x256xf32>
    %c32_11 = arith.constant 32 : index
    %c0_12 = arith.constant 0 : index
    %11 = vector.load %arg9[%c32_11, %c0_12] : memref<256x256xf32, #tpu.memory_space<vmem>>, vector<32x256xf32>
    tpu.vector_store %arg9[%c32_11, %c0_12], %10 {strides = array<i32>} : memref<256x256xf32, #tpu.memory_space<vmem>>, vector<32x256xf32>,
    %c15_i32 = arith.constant 15 : i32
    %12 = tpu.dynamic_rotate %3 by %c15_i32 dim 1 : vector<32x256xf32>, i32 -> vector<32x256xf32>
    %c64 = arith.constant 64 : index
    %c0_13 = arith.constant 0 : index
    %13 = vector.load %arg7[%c64, %c0_13] : memref<256x256xf32, #tpu.memory_space<vmem>>, vector<32x256xf32>
    %14 = arith.mulf %12, %13 : vector<32x256xf32>
    %c64_14 = arith.constant 64 : index
    %c0_15 = arith.constant 0 : index
    %15 = vector.load %arg9[%c64_14, %c0_15] : memref<256x256xf32, #tpu.memory_space<vmem>>, vector<32x256xf32>
    tpu.vector_store %arg9[%c64_14, %c0_15], %14 {strides = array<i32>} : memref<256x256xf32, #tpu.memory_space<vmem>>, vector<32x256xf32>,
    %c1_i32 = arith.constant 1 : i32
    %16 = tpu.dynamic_rotate %3 by %c1_i32 dim 1 : vector<32x256xf32>, i32 -> vector<32x256xf32>
    %c96 = arith.constant 96 : index
    %c0_16 = arith.constant 0 : index
    %17 = vector.load %arg7[%c96, %c0_16] : memref<256x256xf32, #tpu.memory_space<vmem>>, vector<32x256xf32>
    %18 = arith.mulf %16, %17 : vector<32x256xf32>
    %c96_17 = arith.constant 96 : index
    %c0_18 = arith.constant 0 : index
    %19 = vector.load %arg9[%c96_17, %c0_18] : memref<256x256xf32, #tpu.memory_space<vmem>>, vector<32x256xf32>
    tpu.vector_store %arg9[%c96_17, %c0_18], %18 {strides = array<i32>} : memref<256x256xf32, #tpu.memory_space<vmem>>, vector<32x256xf32>,
    %c255_i32 = arith.constant 255 : i32
    %20 = tpu.dynamic_rotate %3 by %c255_i32 dim 1 : vector<32x256xf32>, i32 -> vector<32x256xf32>
    %c128 = arith.constant 128 : index
    %c0_19 = arith.constant 0 : index
    %21 = vector.load %arg7[%c128, %c0_19] : memref<256x256xf32, #tpu.memory_space<vmem>>, vector<32x256xf32>
    %22 = arith.mulf %20, %21 : vector<32x256xf32>
    %c128_20 = arith.constant 128 : index
    %c0_21 = arith.constant 0 : index
    %23 = vector.load %arg9[%c128_20, %c0_21] : memref<256x256xf32, #tpu.memory_space<vmem>>, vector<32x256xf32>
    tpu.vector_store %arg9[%c128_20, %c0_21], %22 {strides = array<i32>} : memref<256x256xf32, #tpu.memory_space<vmem>>, vector<32x256xf32>,
    %c241_i32 = arith.constant 241 : i32
    %24 = tpu.dynamic_rotate %3 by %c241_i32 dim 1 : vector<32x256xf32>, i32 -> vector<32x256xf32>
    %c160 = arith.constant 160 : index
    %c0_22 = arith.constant 0 : index
    %25 = vector.load %arg7[%c160, %c0_22] : memref<256x256xf32, #tpu.memory_space<vmem>>, vector<32x256xf32>
    %26 = arith.mulf %24, %25 : vector<32x256xf32>
    %c160_23 = arith.constant 160 : index
    %c0_24 = arith.constant 0 : index
    %27 = vector.load %arg9[%c160_23, %c0_24] : memref<256x256xf32, #tpu.memory_space<vmem>>, vector<32x256xf32>
    tpu.vector_store %arg9[%c160_23, %c0_24], %26 {strides = array<i32>} : memref<256x256xf32, #tpu.memory_space<vmem>>, vector<32x256xf32>,
    %c240_i32 = arith.constant 240 : i32
    %28 = tpu.dynamic_rotate %3 by %c240_i32 dim 1 : vector<32x256xf32>, i32 -> vector<32x256xf32>
    %c192 = arith.constant 192 : index
    %c0_25 = arith.constant 0 : index
    %29 = vector.load %arg7[%c192, %c0_25] : memref<256x256xf32, #tpu.memory_space<vmem>>, vector<32x256xf32>
    %30 = arith.mulf %28, %29 : vector<32x256xf32>
    %c192_26 = arith.constant 192 : index
    %c0_27 = arith.constant 0 : index
    %31 = vector.load %arg9[%c192_26, %c0_27] : memref<256x256xf32, #tpu.memory_space<vmem>>, vector<32x256xf32>
    tpu.vector_store %arg9[%c192_26, %c0_27], %30 {strides = array<i32>} : memref<256x256xf32, #tpu.memory_space<vmem>>, vector<32x256xf32>,
    %c239_i32 = arith.constant 239 : i32
    %32 = tpu.dynamic_rotate %3 by %c239_i32 dim 1 : vector<32x256xf32>, i32 -> vector<32x256xf32>
    %c224 = arith.constant 224 : index
    %c0_28 = arith.constant 0 : index
    %33 = vector.load %arg7[%c224, %c0_28] : memref<256x256xf32, #tpu.memory_space<vmem>>, vector<32x256xf32>
    %34 = arith.mulf %32, %33 : vector<32x256xf32>
    %c224_29 = arith.constant 224 : index
    %c0_30 = arith.constant 0 : index
    %35 = vector.load %arg9[%c224_29, %c0_30] : memref<256x256xf32, #tpu.memory_space<vmem>>, vector<32x256xf32>
    tpu.vector_store %arg9[%c224_29, %c0_30], %34 {strides = array<i32>} : memref<256x256xf32, #tpu.memory_space<vmem>>, vector<32x256xf32>,
    %c0_31 = arith.constant 0 : index
    %c0_32 = arith.constant 0 : index
    %c0_33 = arith.constant 0 : index
    %36 = vector.load %arg6[%c0_31, %c0_32, %c0_33] : memref<2x32x1xf32, #tpu.memory_space<vmem>>, vector<1x32x1xf32>
    %37 = vector.shape_cast %36 : vector<1x32x1xf32> to vector<32x1xf32>
    %c0_34 = arith.constant 0 : index
    %c0_35 = arith.constant 0 : index
    %38 = vector.load %arg3[%c0_34, %c0_35] : memref<32x256xf32, #tpu.memory_space<vmem>>, vector<32x256xf32>
    %c0_36 = arith.constant 0 : index
    %c0_37 = arith.constant 0 : index
    %39 = vector.load %arg9[%c0_36, %c0_37] : memref<256x256xf32, #tpu.memory_space<vmem>>, vector<256x256xf32>
    %cst = arith.constant dense<0.000000e+00> : vector<32x256xf32>
    %40 = tpu.matmul %38, %39, %cst {dimension_numbers = #tpu.dot_dimension_numbers<[1], [0], [0], [1], [0, 0, 1, 1], [], []>} : vector<32x256xf32>, vector<256x256xf32>, vector<32x256xf32> -> vector<32x256xf32>
    %c0_38 = arith.constant 0 : index
    %c0_39 = arith.constant 0 : index
    %41 = vector.load %arg2[%c0_38, %c0_39] : memref<32x32xf32, #tpu.memory_space<vmem>>, vector<32x32xf32>
    %c0_40 = arith.constant 0 : index
    %c0_41 = arith.constant 0 : index
    %42 = vector.load %arg10[%c0_40, %c0_41] : memref<32x256xf32, #tpu.memory_space<vmem>>, vector<32x256xf32>
    %cst_42 = arith.constant dense<0.000000e+00> : vector<32x256xf32>
    %43 = tpu.matmul %41, %42, %cst_42 {dimension_numbers = #tpu.dot_dimension_numbers<[1], [0], [0], [1], [0, 0, 1, 1], [], []>} : vector<32x32xf32>, vector<32x256xf32>, vector<32x256xf32> -> vector<32x256xf32>
    %44 = arith.addf %40, %43 : vector<32x256xf32>
    %45 = vector.broadcast %37 : vector<32x1xf32> to vector<32x256xf32>
    %46 = arith.addf %44, %45 : vector<32x256xf32>
    %cst_43 = arith.constant 0.000000e+00 : f32
    %47 = vector.broadcast %cst_43 : f32 to vector<32x256xf32>
    %48 = arith.maximumf %46, %47 : vector<32x256xf32>
    %c0_44 = arith.constant 0 : index
    %c0_45 = arith.constant 0 : index
    %49 = vector.load %arg10[%c0_44, %c0_45] : memref<32x256xf32, #tpu.memory_space<vmem>>, vector<32x256xf32>
    tpu.vector_store %arg10[%c0_44, %c0_45], %48 {strides = array<i32>} : memref<32x256xf32, #tpu.memory_space<vmem>>, vector<32x256xf32>,
    %c0_46 = arith.constant 0 : index
    %c0_47 = arith.constant 0 : index
    %50 = vector.load %arg10[%c0_46, %c0_47] : memref<32x256xf32, #tpu.memory_space<vmem>>, vector<32x256xf32>
    %c17_i32_48 = arith.constant 17 : i32
    %51 = tpu.dynamic_rotate %50 by %c17_i32_48 dim 1 : vector<32x256xf32>, i32 -> vector<32x256xf32>
    %c0_49 = arith.constant 0 : index
    %c0_50 = arith.constant 0 : index
    %52 = vector.load %arg7[%c0_49, %c0_50] : memref<256x256xf32, #tpu.memory_space<vmem>>, vector<32x256xf32>
    %53 = arith.mulf %51, %52 : vector<32x256xf32>
    %c0_51 = arith.constant 0 : index
    %c0_52 = arith.constant 0 : index
    %54 = vector.load %arg9[%c0_51, %c0_52] : memref<256x256xf32, #tpu.memory_space<vmem>>, vector<32x256xf32>
    tpu.vector_store %arg9[%c0_51, %c0_52], %53 {strides = array<i32>} : memref<256x256xf32, #tpu.memory_space<vmem>>, vector<32x256xf32>,
    %c16_i32_53 = arith.constant 16 : i32
    %55 = tpu.dynamic_rotate %50 by %c16_i32_53 dim 1 : vector<32x256xf32>, i32 -> vector<32x256xf32>
    %c32_54 = arith.constant 32 : index
    %c0_55 = arith.constant 0 : index
    %56 = vector.load %arg7[%c32_54, %c0_55] : memref<256x256xf32, #tpu.memory_space<vmem>>, vector<32x256xf32>
    %57 = arith.mulf %55, %56 : vector<32x256xf32>
    %c32_56 = arith.constant 32 : index
    %c0_57 = arith.constant 0 : index
    %58 = vector.load %arg9[%c32_56, %c0_57] : memref<256x256xf32, #tpu.memory_space<vmem>>, vector<32x256xf32>
    tpu.vector_store %arg9[%c32_56, %c0_57], %57 {strides = array<i32>} : memref<256x256xf32, #tpu.memory_space<vmem>>, vector<32x256xf32>,
    %c15_i32_58 = arith.constant 15 : i32
    %59 = tpu.dynamic_rotate %50 by %c15_i32_58 dim 1 : vector<32x256xf32>, i32 -> vector<32x256xf32>
    %c64_59 = arith.constant 64 : index
    %c0_60 = arith.constant 0 : index
    %60 = vector.load %arg7[%c64_59, %c0_60] : memref<256x256xf32, #tpu.memory_space<vmem>>, vector<32x256xf32>
    %61 = arith.mulf %59, %60 : vector<32x256xf32>
    %c64_61 = arith.constant 64 : index
    %c0_62 = arith.constant 0 : index
    %62 = vector.load %arg9[%c64_61, %c0_62] : memref<256x256xf32, #tpu.memory_space<vmem>>, vector<32x256xf32>
    tpu.vector_store %arg9[%c64_61, %c0_62], %61 {strides = array<i32>} : memref<256x256xf32, #tpu.memory_space<vmem>>, vector<32x256xf32>,
    %c1_i32_63 = arith.constant 1 : i32
    %63 = tpu.dynamic_rotate %50 by %c1_i32_63 dim 1 : vector<32x256xf32>, i32 -> vector<32x256xf32>
    %c96_64 = arith.constant 96 : index
    %c0_65 = arith.constant 0 : index
    %64 = vector.load %arg7[%c96_64, %c0_65] : memref<256x256xf32, #tpu.memory_space<vmem>>, vector<32x256xf32>
    %65 = arith.mulf %63, %64 : vector<32x256xf32>
    %c96_66 = arith.constant 96 : index
    %c0_67 = arith.constant 0 : index
    %66 = vector.load %arg9[%c96_66, %c0_67] : memref<256x256xf32, #tpu.memory_space<vmem>>, vector<32x256xf32>
    tpu.vector_store %arg9[%c96_66, %c0_67], %65 {strides = array<i32>} : memref<256x256xf32, #tpu.memory_space<vmem>>, vector<32x256xf32>,
    %c255_i32_68 = arith.constant 255 : i32
    %67 = tpu.dynamic_rotate %50 by %c255_i32_68 dim 1 : vector<32x256xf32>, i32 -> vector<32x256xf32>
    %c128_69 = arith.constant 128 : index
    %c0_70 = arith.constant 0 : index
    %68 = vector.load %arg7[%c128_69, %c0_70] : memref<256x256xf32, #tpu.memory_space<vmem>>, vector<32x256xf32>
    %69 = arith.mulf %67, %68 : vector<32x256xf32>
    %c128_71 = arith.constant 128 : index
    %c0_72 = arith.constant 0 : index
    %70 = vector.load %arg9[%c128_71, %c0_72] : memref<256x256xf32, #tpu.memory_space<vmem>>, vector<32x256xf32>
    tpu.vector_store %arg9[%c128_71, %c0_72], %69 {strides = array<i32>} : memref<256x256xf32, #tpu.memory_space<vmem>>, vector<32x256xf32>,
    %c241_i32_73 = arith.constant 241 : i32
    %71 = tpu.dynamic_rotate %50 by %c241_i32_73 dim 1 : vector<32x256xf32>, i32 -> vector<32x256xf32>
    %c160_74 = arith.constant 160 : index
    %c0_75 = arith.constant 0 : index
    %72 = vector.load %arg7[%c160_74, %c0_75] : memref<256x256xf32, #tpu.memory_space<vmem>>, vector<32x256xf32>
    %73 = arith.mulf %71, %72 : vector<32x256xf32>
    %c160_76 = arith.constant 160 : index
    %c0_77 = arith.constant 0 : index
    %74 = vector.load %arg9[%c160_76, %c0_77] : memref<256x256xf32, #tpu.memory_space<vmem>>, vector<32x256xf32>
    tpu.vector_store %arg9[%c160_76, %c0_77], %73 {strides = array<i32>} : memref<256x256xf32, #tpu.memory_space<vmem>>, vector<32x256xf32>,
    %c240_i32_78 = arith.constant 240 : i32
    %75 = tpu.dynamic_rotate %50 by %c240_i32_78 dim 1 : vector<32x256xf32>, i32 -> vector<32x256xf32>
    %c192_79 = arith.constant 192 : index
    %c0_80 = arith.constant 0 : index
    %76 = vector.load %arg7[%c192_79, %c0_80] : memref<256x256xf32, #tpu.memory_space<vmem>>, vector<32x256xf32>
    %77 = arith.mulf %75, %76 : vector<32x256xf32>
    %c192_81 = arith.constant 192 : index
    %c0_82 = arith.constant 0 : index
    %78 = vector.load %arg9[%c192_81, %c0_82] : memref<256x256xf32, #tpu.memory_space<vmem>>, vector<32x256xf32>
    tpu.vector_store %arg9[%c192_81, %c0_82], %77 {strides = array<i32>} : memref<256x256xf32, #tpu.memory_space<vmem>>, vector<32x256xf32>,
    %c239_i32_83 = arith.constant 239 : i32
    %79 = tpu.dynamic_rotate %50 by %c239_i32_83 dim 1 : vector<32x256xf32>, i32 -> vector<32x256xf32>
    %c224_84 = arith.constant 224 : index
    %c0_85 = arith.constant 0 : index
    %80 = vector.load %arg7[%c224_84, %c0_85] : memref<256x256xf32, #tpu.memory_space<vmem>>, vector<32x256xf32>
    %81 = arith.mulf %79, %80 : vector<32x256xf32>
    %c224_86 = arith.constant 224 : index
    %c0_87 = arith.constant 0 : index
    %82 = vector.load %arg9[%c224_86, %c0_87] : memref<256x256xf32, #tpu.memory_space<vmem>>, vector<32x256xf32>
    tpu.vector_store %arg9[%c224_86, %c0_87], %81 {strides = array<i32>} : memref<256x256xf32, #tpu.memory_space<vmem>>, vector<32x256xf32>,
    %c1 = arith.constant 1 : index
    %c0_88 = arith.constant 0 : index
    %c0_89 = arith.constant 0 : index
    %83 = vector.load %arg6[%c1, %c0_88, %c0_89] : memref<2x32x1xf32, #tpu.memory_space<vmem>>, vector<1x32x1xf32>
    %84 = vector.shape_cast %83 : vector<1x32x1xf32> to vector<32x1xf32>
    %c0_90 = arith.constant 0 : index
    %c0_91 = arith.constant 0 : index
    %85 = vector.load %arg5[%c0_90, %c0_91] : memref<32x256xf32, #tpu.memory_space<vmem>>, vector<32x256xf32>
    %c0_92 = arith.constant 0 : index
    %c0_93 = arith.constant 0 : index
    %86 = vector.load %arg9[%c0_92, %c0_93] : memref<256x256xf32, #tpu.memory_space<vmem>>, vector<256x256xf32>
    %cst_94 = arith.constant dense<0.000000e+00> : vector<32x256xf32>
    %87 = tpu.matmul %85, %86, %cst_94 {dimension_numbers = #tpu.dot_dimension_numbers<[1], [0], [0], [1], [0, 0, 1, 1], [], []>} : vector<32x256xf32>, vector<256x256xf32>, vector<32x256xf32> -> vector<32x256xf32>
    %c0_95 = arith.constant 0 : index
    %c0_96 = arith.constant 0 : index
    %88 = vector.load %arg4[%c0_95, %c0_96] : memref<32x32xf32, #tpu.memory_space<vmem>>, vector<32x32xf32>
    %c0_97 = arith.constant 0 : index
    %c0_98 = arith.constant 0 : index
    %89 = vector.load %arg10[%c0_97, %c0_98] : memref<32x256xf32, #tpu.memory_space<vmem>>, vector<32x256xf32>
    %cst_99 = arith.constant dense<0.000000e+00> : vector<32x256xf32>
    %90 = tpu.matmul %88, %89, %cst_99 {dimension_numbers = #tpu.dot_dimension_numbers<[1], [0], [0], [1], [0, 0, 1, 1], [], []>} : vector<32x32xf32>, vector<32x256xf32>, vector<32x256xf32> -> vector<32x256xf32>
    %91 = arith.addf %87, %90 : vector<32x256xf32>
    %92 = vector.broadcast %84 : vector<32x1xf32> to vector<32x256xf32>
    %93 = arith.addf %91, %92 : vector<32x256xf32>
    %c0_100 = arith.constant 0 : index
    %c0_101 = arith.constant 0 : index
    %c0_102 = arith.constant 0 : index
    %94 = vector.load %arg1[%c0_100, %c0_101, %c0_102] : memref<1x32x256xf32, #tpu.memory_space<vmem>>, vector<1x32x256xf32>
    %95 = vector.shape_cast %94 : vector<1x32x256xf32> to vector<32x256xf32>
    %96 = arith.addf %93, %95 : vector<32x256xf32>
    %cst_103 = arith.constant 0.000000e+00 : f32
    %97 = vector.broadcast %cst_103 : f32 to vector<32x256xf32>
    %98 = arith.maximumf %96, %97 : vector<32x256xf32>
    %c0_104 = arith.constant 0 : index
    %c0_105 = arith.constant 0 : index
    %c0_106 = arith.constant 0 : index
    %99 = vector.load %arg8[%c0_104, %c0_105, %c0_106] : memref<1x32x256xf32, #tpu.memory_space<vmem>>, vector<1x32x256xf32>
    %100 = vector.shape_cast %99 : vector<1x32x256xf32> to vector<32x256xf32>
    %101 = vector.shape_cast %98 : vector<32x256xf32> to vector<1x32x256xf32>
    tpu.vector_store %arg8[%c0_104, %c0_105, %c0_106], %101 {strides = array<i32>} : memref<1x32x256xf32, #tpu.memory_space<vmem>>, vector<1x32x256xf32>,
    return
  }
  func.func @transform_0(%arg0: i32) -> (i32, i32, i32) {
    %c0_i32 = arith.constant 0 : i32
    %c0_i32_0 = arith.constant 0 : i32
    %c0_i32_1 = arith.constant 0 : i32
    return %arg0, %c0_i32, %c0_i32_0 : i32, i32, i32
  }
  func.func @transform_1(%arg0: i32) -> (i32, i32) {
    %c0_i32 = arith.constant 0 : i32
    %c0_i32_0 = arith.constant 0 : i32
    %c0_i32_1 = arith.constant 0 : i32
    return %c0_i32, %c0_i32_0 : i32, i32
  }
  func.func @transform_2(%arg0: i32) -> (i32, i32) {
    %c0_i32 = arith.constant 0 : i32
    %c0_i32_0 = arith.constant 0 : i32
    %c0_i32_1 = arith.constant 0 : i32
    return %c0_i32, %c0_i32_0 : i32, i32
  }
  func.func @transform_3(%arg0: i32) -> (i32, i32) {
    %c0_i32 = arith.constant 0 : i32
    %c0_i32_0 = arith.constant 0 : i32
    %c0_i32_1 = arith.constant 0 : i32
    return %c0_i32, %c0_i32_0 : i32, i32
  }
  func.func @transform_4(%arg0: i32) -> (i32, i32) {
    %c0_i32 = arith.constant 0 : i32
    %c0_i32_0 = arith.constant 0 : i32
    %c0_i32_1 = arith.constant 0 : i32
    return %c0_i32, %c0_i32_0 : i32, i32
  }
  func.func @transform_5(%arg0: i32) -> (i32, i32, i32) {
    %c0_i32 = arith.constant 0 : i32
    %c0_i32_0 = arith.constant 0 : i32
    %c0_i32_1 = arith.constant 0 : i32
    %c0_i32_2 = arith.constant 0 : i32
    return %c0_i32, %c0_i32_0, %c0_i32_1 : i32, i32, i32
  }
  func.func @transform_6(%arg0: i32) -> (i32, i32) {
    %c0_i32 = arith.constant 0 : i32
    %c0_i32_0 = arith.constant 0 : i32
    %c0_i32_1 = arith.constant 0 : i32
    return %c0_i32, %c0_i32_0 : i32, i32
  }
  func.func @transform_7(%arg0: i32) -> (i32, i32, i32) {
    %c0_i32 = arith.constant 0 : i32
    %c0_i32_0 = arith.constant 0 : i32
    %c0_i32_1 = arith.constant 0 : i32
    return %arg0, %c0_i32, %c0_i32_0 : i32, i32, i32
  }
}

</mosaic_0001>

<bundles_post_ra>
// kernel: tpu_custom_call.1
= control target key start
LH: loop header
LB: loop body
LE: loop exit
PB: predicated region body
PF: predicated region fallthrough
CT: control target
= control target key end

     0   :  { %s3825_s0 = inlined_call_operand.hbm [shape: f32[2,32,256], index: 0, kind: input, shape index: {}]   ;;  %s3826_s1 = inlined_call_operand.hbm [shape: f32[32,32], index: 1, kind: input, shape index: {}]   ;;  %s3827_s2 = inlined_call_operand.vmem [shape: f32[32,256], index: 2, kind: input, shape index: {}]   ;;  %s3828_s3 = inlined_call_operand.hbm [shape: f32[32,32], index: 3, kind: input, shape index: {}]   ;;  %s3829_s4 = inlined_call_operand.hbm [shape: f32[32,256], index: 4, kind: input, shape index: {}]   ;;  %s3830_s5 = inlined_call_operand.vmem [shape: f32[2,32,1], index: 5, kind: input, shape index: {}]   ;;  %s3831_s6 = inlined_call_operand.hbm [shape: f32[256,256], index: 6, kind: input, shape index: {}]   ;;  %s3832_s7 = inlined_call_operand.hbm [shape: f32[2,32,256], index: 7, kind: output, shape index: {}]  }
   0x1   :  { %3867 = sst [smem:[#allocation32_spill]] %s3826_s1 }
   0x2   :  { %12 = vsyncpa [#allocation5], 0 }
   0x3   :  { %14 = vsyncpa [#allocation5 + $0x1], 0 }
   0x4   :  { %15 = vsyncpa [#allocation8], 0 }
   0x5   :  { %16 = vsyncpa [#allocation11], 0 }
   0x6   :  { %17 = vsyncpa [#allocation6], 0 }
   0x7   :  { %19 = vsyncpa [#allocation6 + $0x1], 0  ;;  %s2531_s24 = smov 0   ;;  %s2533_s25 = smov 0  }
   0x8   :  { %s2535_s26 = smov 0   ;;  %s2537_s27 = smov 0  }
   0x9 LB: > { %s2552_s28 = sadd.s32 4294967295, %s2468_s27   ;;  %s1952_s29 = sadd.s32 4294967294, %s2468_s27   ;;  %s2468_s27 = sphi %s2537_s27, %s3936_s27   ;;  %s2464_s26 = sphi %s2535_s26, %s3935_s26   ;;  %s2460_s25 = sphi %s2533_s25, %s3934_s25   ;;  %s2456_s24 = sphi %s2531_s24, %s3933_s24  }
   0xa   : > { %p45_p0 = scmp.ne.s32.totalorder %s2460_s25, %s2456_s24  ;;  %p3833_p1 = scmp.eq.s32.totalorder %s2552_s28, 0 }
   0xb   : > { %p201_p3 = scmp.eq.s32.totalorder %s1952_s29, 1  ;;  %p1953_p5 = scmp.ge.s32.totalorder %s2468_s27, 1 }
   0xc   : > { %p2561_p4 = por %p3833_p1, %p45_p0  ;;  %p208_p7 = scmp.lt.s32.totalorder %s2468_s27, 3 }
   0xd   : > { %p2566_p6 = por %p201_p3, %p45_p0  ;;  %s2470_s10 = smov [#allocation7]  }
   0xe   : > { %s3868_s30 = scalar_select %p2561_p4, 1, 0 }
   0xf   : > { %s3869_s8 = scalar_select %p2566_p6, 1, 0 }
  0x10   : > { %p2571_p8 = pnand %p1953_p5, %p208_p7  ;;  %s220_s11 = sshll.u32 %s2470_s10, 4  ;;  %s2575_s11 = int_to_ptr.vmem [resolvable:$true] %s220_s11 }
  0x11   : > { %s2471_s13 = smov [#allocation10]   ;;  %s3872_s1 = sld [smem:[#allocation32_spill]] }
  0x12   : > { %s3870_s9 = scalar_select %p2571_p8, 1, 0 }
  0x13   : > { %p2168_p9 = pneg %p2571_p8  ;;  %s249_s14 = sshll.u32 %s2471_s13, 4  ;;  %s2586_s14 = int_to_ptr.vmem [resolvable:$true] %s249_s14 }
  0x15   : > { %p2582_p11 = pnand %p2168_p9, %p3833_p1 }
  0x17   : > { %s2252_s17 = scalar_lea.hbm %s3872_s1, 512  ;;  %p2596_p13 = pneg %p2582_p11 }
  0x18   : > { %p2253_p12 = scmp.ne.s32.totalorder %s3872_s1, %s2252_s17  ;;  %p2259_p5 = scmp.lt.u32.totalorder %s2252_s17, %s3872_s1 }
  0x1a   : > { %p2255_p0 = pnand %p2596_p13, %p2253_p12 }
  0x1c   : > { %p2256_p3 = pneg %p2255_p0 }
  0x1e   : > { %p2261_p7 = pnand %p2259_p5, %p2256_p3 }
  0x20   : > { %2264 = shalt.err (!%p2261_p7)
}
  0x21   : > { %s2265_s23 = scalar_lea.vmem %s2575_s11, 512  ;;  %p2273_p2 = scmp.lt.s32.totalorder %s2575_s11, %s2575_s11 }
  0x22   : > { %p2266_p9 = scmp.ne.s32.totalorder %s2575_s11, %s2265_s23  ;;  %p2274_p6 = scmp.lt.s32.totalorder %s2265_s23, %s2265_s23 }
  0x24   : > { %p2268_p10 = pnand %p2266_p9, %p2596_p13  ;;  %p2275_p12 = por %p2274_p6, %p2273_p2 }
  0x26   : > { %p2269_p1 = pneg %p2268_p10 }
  0x28   : > { %p2276_p0 = pnand %p2275_p12, %p2269_p1 }
  0x2a   : > { %2279 = shalt.err (!%p2276_p0)
}
  0x2b   : > { %s3834_s29 = smov 128   ;;  %s3835_s10 = smov 8  }
  0x2c   : > { %2171 = dma.hbm_to_vmem [thread:$0]  (!%p2582_p11), %s3872_s1, 512, %s2575_s11, [#allocation8], %s3834_s29, %s3834_s29, %s3835_s10  }
  0x2d   : > { %s2280_s18 = scalar_lea.hbm %s3829_s4, 1024 }
  0x2e   : > { %p2281_p1 = scmp.ne.s32.totalorder %s3829_s4, %s2280_s18  ;;  %p2287_p10 = scmp.lt.u32.totalorder %s2280_s18, %s3829_s4 }
  0x30   : > { %p2283_p2 = pnand %p2281_p1, %p2596_p13 }
  0x32   : > { %p2284_p6 = pneg %p2283_p2 }
  0x34   : > { %p2289_p3 = pnand %p2287_p10, %p2284_p6 }
  0x36   : > { %2292 = shalt.err (!%p2289_p3)
}
  0x37   : > { %s2293_s11 = scalar_lea.vmem %s2586_s14, 1024  ;;  %p2301_p12 = scmp.lt.s32.totalorder %s2586_s14, %s2586_s14 }
  0x38   : > { %p2294_p5 = scmp.ne.s32.totalorder %s2586_s14, %s2293_s11  ;;  %p2302_p0 = scmp.lt.s32.totalorder %s2293_s11, %s2293_s11 }
  0x3a   : > { %p2296_p7 = pnand %p2294_p5, %p2596_p13  ;;  %p2303_p1 = por %p2302_p0, %p2301_p12 }
  0x3c   : > { %p2297_p9 = pneg %p2296_p7 }
  0x3e   : > { %p2304_p2 = pnand %p2303_p1, %p2297_p9 }
  0x40   : > { %2307 = shalt.err (!%p2304_p2)
}
  0x41   : > { %s3838_s13 = smov 256   ;;  %s2475_s15 = smov 16  }
  0x42   : > { %2177 = dma.hbm_to_vmem [thread:$0]  (!%p2582_p11), %s3829_s4, 1024, %s2586_s14, [#allocation11], %s3838_s13, %s3838_s13, %s2475_s15  }
  0x43   : > { %s2476_s18 = smov [#allocation9]   ;;  %s2477_s21 = smov [#allocation12]  }
  0x44   : > { %s236_s19 = sshll.u32 %s2476_s18, 4  ;;  %s265_s22 = sshll.u32 %s2477_s21, 4  ;;  %s237_s19 = int_to_ptr.vmem [resolvable:$true] %s236_s19  ;;  %s2646_s22 = int_to_ptr.vmem [resolvable:$true] %s265_s22 }
  0x45   : > { %s2308_s29 = scalar_lea.hbm %s3828_s3, 512 }
  0x46   : > { %p2309_p6 = scmp.ne.s32.totalorder %s3828_s3, %s2308_s29  ;;  %p2315_p5 = scmp.lt.u32.totalorder %s2308_s29, %s3828_s3 }
  0x48   : > { %p2311_p10 = pnand %p2309_p6, %p2596_p13 }
  0x4a   : > { %p2312_p3 = pneg %p2311_p10 }
  0x4c   : > { %p2317_p7 = pnand %p2315_p5, %p2312_p3 }
  0x4e   : > { %2320 = shalt.err (!%p2317_p7)
}
  0x4f   : > { %s2321_s17 = scalar_lea.vmem %s237_s19, 512  ;;  %p2329_p1 = scmp.lt.s32.totalorder %s237_s19, %s237_s19 }
  0x50   : > { %p2322_p9 = scmp.ne.s32.totalorder %s237_s19, %s2321_s17  ;;  %p2330_p2 = scmp.lt.s32.totalorder %s2321_s17, %s2321_s17 }
  0x52   : > { %p2324_p12 = pnand %p2322_p9, %p2596_p13  ;;  %p2331_p4 = por %p2330_p2, %p2329_p1 }
  0x54   : > { %p2325_p0 = pneg %p2324_p12 }
  0x56   : > { %p2332_p8 = pnand %p2331_p4, %p2325_p0 }
  0x58   : > { %2335 = shalt.err (!%p2332_p8)
}
  0x59   : > { %s3874_s1 = smov 8   ;;  %s3875_s10 = smov 128  }
  0x5a   : > { %2174 = dma.hbm_to_vmem [thread:$0]  (!%p2582_p11), %s3828_s3, 512, %s237_s19, [#allocation8], %s3875_s10, %s3875_s10, %s3874_s1  }
  0x5b   : > { %s2336_s11 = scalar_lea.hbm %s3831_s6, 8192 }
  0x5c   : > { %p2337_p6 = scmp.ne.s32.totalorder %s3831_s6, %s2336_s11  ;;  %p2343_p10 = scmp.lt.u32.totalorder %s2336_s11, %s3831_s6 }
  0x5e   : > { %p2339_p4 = pnand %p2337_p6, %p2596_p13 }
  0x60   : > { %p2340_p8 = pneg %p2339_p4 }
  0x62   : > { %p2345_p3 = pnand %p2343_p10, %p2340_p8 }
  0x64   : > { %2348 = shalt.err (!%p2345_p3)
}
  0x65   : > { %s2349_s19 = scalar_lea.vmem %s2646_s22, 8192  ;;  %p2357_p12 = scmp.lt.s32.totalorder %s2646_s22, %s2646_s22 }
  0x66   : > { %p2350_p5 = scmp.ne.s32.totalorder %s2646_s22, %s2349_s19  ;;  %p2358_p0 = scmp.lt.s32.totalorder %s2349_s19, %s2349_s19 }
  0x68   : > { %p2352_p7 = pnand %p2350_p5, %p2596_p13  ;;  %p2359_p1 = por %p2358_p0, %p2357_p12 }
  0x6a   : > { %p2353_p9 = pneg %p2352_p7 }
  0x6c   : > { %p2360_p2 = pnand %p2359_p1, %p2353_p9 }
  0x6e   : > { %2363 = shalt.err (!%p2360_p2)
}
  0x6f   : > { %s3876_s13 = smov 256   ;;  %s2696_s12 = sadd.s32 1, %s2468_s27  }
  0x70   : > { %2180 = dma.hbm_to_vmem [thread:$0]  (!%p2582_p11), %s3831_s6, 8192, %s2646_s22, [#allocation11], %s3876_s13, %s3876_s13, %s2475_s15  }
  0x71   : > { %s29_s20 = ssub.s32 %s2468_s27, %s2696_s12  ;;  %s32_s18 = sadd.s32 1, %s2464_s26 }
  0x72   : > { %p30_p13 = scmp.eq.s32.totalorder %s29_s20, 0  ;;  %p39_p6 = scmp.ne.s32.totalorder %s2464_s26, %s2460_s25 }
  0x73   : > { %p40_p4 = scmp.eq.s32.totalorder %s2468_s27, 0  ;;  %p3877_p10 = scmp.eq.s32.totalorder %s2552_s28, 1 }
  0x74   : > { %s2705_s29 = scalar_select %p30_p13, %s2464_s26, %s32_s18  }
  0x75   : > { %p41_p8 = por %p40_p4, %p39_p6  ;;  %p2709_p3 = por %p3877_p10, %p39_p6 }
  0x76   : > { %p2193_p5 = scmp.lt.s32.totalorder %s2468_s27, 2  ;;  %s279_s23 = sand.u32 1, %s2464_s26  }
  0x77   : > { %s1959_s11 = sshll.u32 %s279_s23, 6  ;;  %s1986_s22 = sshll.u32 %s2468_s27, 10 }
  0x78   : > { %s2719_s17 = scalar_lea.hbm %s3825_s0, %s1986_s22  ;;  %s283_s19 = scalar_lea.vmem [#allocation4], %s1959_s11 }
  0x79   : > { %s290_s1 = sshll.u32 %s283_s19, 4  ;;  %p2723_p11 = pnand %p2193_p5, %p41_p8  ;;  %s2721_s1 = int_to_ptr.vmem [resolvable:$true] %s290_s1 }
  0x7a   : > { %s2727_s20 = scalar_lea.sflag [#allocation5], %s279_s23  ;;  %s2364_s18 = scalar_lea.hbm %s2719_s17, 1024 }
  0x7b   : > { %p2365_p7 = scmp.ne.s32.totalorder %s2719_s17, %s2364_s18  ;;  %p2366_p9 = pneg %p2723_p11 }
  0x7c   : > { %s2369_s16 = scalar_lea.hbm %s3825_s0, 2048  ;;  %p2370_p1 = scmp.lt.u32.totalorder %s2719_s17, %s3825_s0 }
  0x7d   : > { %p2367_p12 = pnand %p2366_p9, %p2365_p7  ;;  %p2371_p2 = scmp.lt.u32.totalorder %s2369_s16, %s2364_s18 }
  0x7e   : > { %p2373_p6 = scmp.lt.u32.totalorder %s2364_s18, %s2719_s17 }
  0x7f   : > { %p2368_p0 = pneg %p2367_p12  ;;  %p2372_p13 = por %p2371_p2, %p2370_p1 }
  0x81   : > { %p2374_p4 = por %p2373_p6, %p2372_p13 }
  0x83   : > { %p2375_p8 = pnand %p2374_p4, %p2368_p0 }
  0x85   : > { %2378 = shalt.err (!%p2375_p8)
}
  0x86   : > { %s2379_s23 = scalar_lea.vmem %s2721_s1, 1024  ;;  %s2478_s11 = smov [#allocation4]  }
  0x87   : > { %p2380_p10 = scmp.ne.s32.totalorder %s2721_s1, %s2379_s23  ;;  %s2384_s22 = sshll.u32 %s2478_s11, 4  ;;  %s2385_s22 = int_to_ptr.vmem [resolvable:$false] %s2384_s22 }
  0x88   : > { %s2386_s14 = scalar_lea.vmem %s2385_s22, 2048  ;;  %p2387_p12 = scmp.lt.s32.totalorder %s2721_s1, %s2385_s22 }
  0x89   : > { %p2382_p5 = pnand %p2380_p10, %p2366_p9  ;;  %p2388_p1 = scmp.lt.s32.totalorder %s2386_s14, %s2379_s23 }
  0x8b   : > { %p2383_p7 = pneg %p2382_p5  ;;  %p2389_p2 = por %p2388_p1, %p2387_p12 }
  0x8d   : > { %p2390_p13 = pnand %p2389_p2, %p2383_p7 }
  0x8f   : > { %2393 = shalt.err (!%p2390_p13)
}
  0x90   : > { %2184 = dma.hbm_to_vmem [thread:$0]  (!%p2723_p11), %s2719_s17, 1024, %s2721_s1, %s2727_s20, %s3876_s13, %s3876_s13, %s2475_s15  }
  0x91   : > { %p3880_p9 = scmp.ne.s32.totalorder %s3870_s9, 0 }
  0x93   : > { %302 = sbr.rel (%p3880_p9) target bundleno = 1129 (0x469), region = 48 }
  0x9a   : > { %s2761_s18 = sand.u32 1, %s2460_s25   ;;  %p3881_p0 = scmp.ne.s32.totalorder %s3868_s30, 0 }
  0x9b   : > { %s3843_s16 = sshll.u32 %s2761_s18, 6  ;;  %s305_s19 = scalar_lea.sflag [#allocation5], %s2761_s18 }
  0x9c   : > { %s2767_s10 = scalar_lea.vmem [#allocation4], %s3843_s16 }
  0x9d   : > { %2439 = dma.done.wait (%p3881_p0), %s305_s19, 1024  }
  0x9e   : > { %2441 = vsyncadd (%p3881_p0), %s305_s19, 4294966272  ;;  %p3882_p11 = scmp.eq.s32.totalorder %s2552_s28, 0 }
  0xa0   : > { %2443 = dma.done.wait (%p3882_p11), [#allocation8], 1024   ;;  %p3883_p6 = pmov %p3882_p11 }
  0xa2   : > { %2445 = vsyncadd (%p3883_p6), [#allocation8], 4294966272  ;;  %p3884_p4 = pmov %p3883_p6 }
  0xa4   : > { %2447 = dma.done.wait (%p3884_p4), [#allocation11], 9216   ;;  %p3885_p8 = pmov %p3884_p4 }
  0xa5   : > { %v3840_v0 = vmov 0.0   ;;  %v2784_v1 = vld [vmem:[%s2767_s10 + $0x8] sm:$0xff]  ;;  %v2787_v2 = vld [vmem:[%s2767_s10] sm:$0xff]  ;;  %v2790_v3 = vld [vmem:[%s2767_s10 + $0x18] sm:$0xff]  ;;  %s2480_s30 = smov 17   ;;  %vm861_vm0 = vcmask 261120   ;;  %v395_v14 = vlaneseq }
  0xa6   : > { %2449 = vsyncadd (%p3885_p8), [#allocation11], 4294958080  ;;  %938 = vmatprep.mubr.f32.mxu0 %v3840_v0  ;;  %1653 = vmatprep.mubr.f32.mxu1 %v3840_v0  ;;  %v2797_v4 = vld [vmem:[%s2767_s10 + $0x10] sm:$0xff]  ;;  %v1988_v5 = vpack.c.bf16 %v2790_v3, %v2784_v1  ;;  %v2802_v6 = vld [vmem:[%s2767_s10 + $0x38] sm:$0xff]  ;;  %s2481_s9 = smov 16   ;;  %s2482_s15 = smov 15  }
  0xa7   : > { %387 = vrot.lane.b32.xlu1 %v2784_v1, %s2480_s30  ;;  %379 = vrot.lane.b32.xlu0 %v2787_v2, %s2480_s30  ;;  %v2805_v7 = vld [vmem:[%s2767_s10 + $0x28] sm:$0xff]  ;;  %v1990_v8 = vpack.c.bf16 %v2797_v4, %v2787_v2  ;;  %v2810_v9 = vld [vmem:[%s2767_s10 + $0x30] sm:$0xff]  ;;  %v849_v13 = vld [vmem:[#allocation7] sm:$0xff]  ;;  %s3852_s13 = smov 1   ;;  %s3850_s17 = smov 127   ;;  %v2930_v16 = vand.u32 127, %v395_v14 }
  0xa8   : > { %v2813_v10 = vld [vmem:[%s2767_s10 + $0x20] sm:$0xff]  ;;  %1989 = vmatprep.subr.bf16.mxu0 %v1988_v5  ;;  %v1992_v11 = vpack.c.bf16 %v2802_v6, %v2805_v7  ;;  %s3848_s1 = smov 113   ;;  %s3846_s20 = smov 112   ;;  %v850_v15 = vld [vmem:[#allocation7 + $0x8] sm:$0xff]  ;;  %v851_v17 = vld [vmem:[#allocation7 + $0x10] sm:$0xff] }
  0xa9   : > { %1991 = vmatpush1.bf16.msra.mxu0 %v1990_v8  ;;  %v1994_v12 = vpack.c.bf16 %v2810_v9, %v2813_v10  ;;  %s3844_s23 = smov 111   ;;  %vm397_vm1 = vcmp.lt.s32.totalorder %v2930_v16, 17  ;;  %v852_v20 = vld [vmem:[#allocation7 + $0x18] sm:$0xff]  ;;  %v2940_v21 = vld [vmem:[#allocation12] sm:$0xff]  ;;  %v2942_v22 = vld [vmem:[#allocation12 + $0x8] sm:$0xff]  ;;  %vm446_vm2 = vcmp.lt.s32.totalorder %v2930_v16, 16 }
  0xaa   : > { %1993 = vmatprep.subr.bf16.mxu0 %v1992_v11  ;;  %v2952_v25 = vld [vmem:[#allocation12 + $0x10] sm:$0xff]  ;;  %v2954_v26 = vld [vmem:[#allocation12 + $0x18] sm:$0xff]  ;;  %v778_v27 = vld [vmem:[%s3827_s2 + $0x8] sm:$0xff]  ;;  %vm495_vm3 = vcmp.lt.s32.totalorder %v2930_v16, 15  ;;  %vm544_vm4 = vcmp.lt.s32.totalorder %v2930_v16, 1  ;;  %vm593_vm5 = vcmp.lt.s32.totalorder %v2930_v16, 127 }
  0xab   : > { %389 = vrot.lane.b32.xlu1 %v2790_v3, %s2480_s30  ;;  %381 = vrot.lane.b32.xlu0 %v2797_v4, %s2480_s30  ;;  %v412_v40 = vld [vmem:[#allocation12 + $0x30] sm:$0xff]  ;;  %v413_v41 = vld [vmem:[#allocation12 + $0x38] sm:$0xff]  ;;  %v410_v42 = vld [vmem:[#allocation12 + $0x20] sm:$0xff]  ;;  %vm642_vm6 = vcmp.lt.s32.totalorder %v2930_v16, 113  ;;  %vm691_vm7 = vcmp.lt.s32.totalorder %v2930_v16, 112  ;;  %vm740_vm8 = vcmp.lt.s32.totalorder %v2930_v16, 111 }
  0xac   : > { %v411_v43 = vld [vmem:[#allocation12 + $0x28] sm:$0xff]  ;;  %v2985_v58 = vld [vmem:[#allocation12 + $0x50] sm:$0xff]  ;;  %v773_v60 = vld [vmem:[%s3830_s5] sm:$0xff]  ;;  %s3900_s16 = smov 1  }
  0xad   : > { %1995 = vmatpush1.bf16.msra.mxu0 %v1994_v12  ;;  %v774_v59 = vld [vmem:[%s3830_s5 + $0x8] sm:$0xff]  ;;  %v2993_v61 = vld [vmem:[#allocation12 + $0x58] sm:$0xff]  ;;  %v2995_v62 = vld [vmem:[#allocation12 + $0x40] sm:$0xff] }
  0xae   : > { %v2997_v63 = vld [vmem:[#allocation12 + $0x48] sm:$0xff]  ;;  %v775_v8 = vld [vmem:[%s3830_s5 + $0x10] sm:$0xff] }
  0xaf   : > { %385 = vrot.lane.b32.xlu1 %v2810_v9, %s2480_s30  ;;  %383 = vrot.lane.b32.xlu0 %v2813_v10, %s2480_s30  ;;  %v1495_v16 = vld [vmem:[#allocation10 + $0x10] sm:$0xff] }
  0xb0   : > { %1969 = vmatmul.mubr.msk.f32.vlgmr.msra.gmra.mrb[0].mxu0 %vm861_vm0, %v849_v13  ;;  %v776_v13 = vld [vmem:[%s3830_s5 + $0x18] sm:$0xff] }
  0xb1   : > { %944 = vmatprep.mubr.f32.mxu0 %v3840_v0 }
  0xb3   : > { %393 = vrot.lane.b32.xlu1 %v2802_v6, %s2480_s30  ;;  %391 = vrot.lane.b32.xlu0 %v2805_v7, %s2480_s30 }
  0xb4   : > { %1970 = vmatmul.mubr.msk.f32.gmra.mrb[2].mxu0 %vm861_vm0, %v850_v15 }
  0xb5   : > { %950 = vmatprep.mubr.f32.mxu0 %v3840_v0 }
  0xb7   : > { %432 = vrot.lane.b32.xlu1 %v2797_v4, %s2481_s9  ;;  %430 = vrot.lane.b32.xlu0 %v2787_v2, %s2481_s9 }
  0xb8   : > { %1971 = vmatmul.mubr.msk.f32.gmra.mrb[4].mxu0 %vm861_vm0, %v851_v17 }
  0xb9   : > { %956 = vmatprep.mubr.f32.mxu0 %v3840_v0  ;;  %v3237_v0 = vld [vmem:[#allocation12 + $0x1e0] sm:$0xff] }
  0xba   : > { %3898 = vst [vmem:[#allocation30_spill] sm:$0xff] %v3237_v0 }
  0xbb   : > { %440 = vrot.lane.b32.xlu1 %v2790_v3, %s2481_s9  ;;  %438 = vrot.lane.b32.xlu0 %v2784_v1, %s2481_s9 }
  0xbc   : > { %1972 = vmatmul.mubr.msk.f32.gmra.mrb[6].mxu0 %vm861_vm0, %v852_v20  ;;  %v462_v20 = vld [vmem:[#allocation12 + $0x78] sm:$0xff] }
  0xbd   : > { %1027 = vmatprep.mubr.f32.mxu0 %v778_v27 }
  0xbf   : > { %436 = vrot.lane.b32.xlu1 %v2810_v9, %s2481_s9  ;;  %434 = vrot.lane.b32.xlu0 %v2813_v10, %s2481_s9 }
  0xc3   : > { %444 = vrot.lane.b32.xlu1 %v2802_v6, %s2481_s9  ;;  %442 = vrot.lane.b32.xlu0 %v2805_v7, %s2481_s9 }
  0xc7   : > { %481 = vrot.lane.b32.xlu1 %v2797_v4, %s2482_s15  ;;  %479 = vrot.lane.b32.xlu0 %v2787_v2, %s2482_s15 }
  0xcb   : > { %489 = vrot.lane.b32.xlu1 %v2790_v3, %s2482_s15  ;;  %487 = vrot.lane.b32.xlu0 %v2784_v1, %s2482_s15 }
  0xcf   : > { %485 = vrot.lane.b32.xlu1 %v2810_v9, %s2482_s15  ;;  %483 = vrot.lane.b32.xlu0 %v2813_v10, %s2482_s15 }
  0xd3   : > { %493 = vrot.lane.b32.xlu1 %v2802_v6, %s2482_s15  ;;  %491 = vrot.lane.b32.xlu0 %v2805_v7, %s2482_s15 }
  0xd7   : > { %530 = vrot.lane.b32.xlu1 %v2797_v4, %s3852_s13  ;;  %528 = vrot.lane.b32.xlu0 %v2787_v2, %s3852_s13 }
  0xdb   : > { %538 = vrot.lane.b32.xlu1 %v2790_v3, %s3852_s13  ;;  %536 = vrot.lane.b32.xlu0 %v2784_v1, %s3852_s13 }
  0xdf   : > { %534 = vrot.lane.b32.xlu1 %v2810_v9, %s3852_s13  ;;  %532 = vrot.lane.b32.xlu0 %v2813_v10, %s3852_s13 }
  0xe3   : > { %542 = vrot.lane.b32.xlu1 %v2802_v6, %s3852_s13  ;;  %540 = vrot.lane.b32.xlu0 %v2805_v7, %s3852_s13  ;;  %s3901_s13 = smov 127  }
  0xe7   : > { %579 = vrot.lane.b32.xlu1 %v2797_v4, %s3850_s17  ;;  %577 = vrot.lane.b32.xlu0 %v2787_v2, %s3850_s17 }
  0xeb   : > { %587 = vrot.lane.b32.xlu1 %v2790_v3, %s3850_s17  ;;  %585 = vrot.lane.b32.xlu0 %v2784_v1, %s3850_s17 }
  0xef   : > { %583 = vrot.lane.b32.xlu1 %v2810_v9, %s3850_s17  ;;  %581 = vrot.lane.b32.xlu0 %v2813_v10, %s3850_s17 }
  0xf3   : > { %591 = vrot.lane.b32.xlu1 %v2802_v6, %s3850_s17  ;;  %589 = vrot.lane.b32.xlu0 %v2805_v7, %s3850_s17  ;;  %s3902_s17 = smov 113  }
  0xf7   : > { %628 = vrot.lane.b32.xlu1 %v2797_v4, %s3848_s1  ;;  %626 = vrot.lane.b32.xlu0 %v2787_v2, %s3848_s1 }
  0xfb   : > { %636 = vrot.lane.b32.xlu1 %v2790_v3, %s3848_s1  ;;  %634 = vrot.lane.b32.xlu0 %v2784_v1, %s3848_s1 }
  0xff   : > { %632 = vrot.lane.b32.xlu1 %v2810_v9, %s3848_s1  ;;  %630 = vrot.lane.b32.xlu0 %v2813_v10, %s3848_s1 }
 0x103   : > { %640 = vrot.lane.b32.xlu1 %v2802_v6, %s3848_s1  ;;  %638 = vrot.lane.b32.xlu0 %v2805_v7, %s3848_s1  ;;  %s3904_s1 = smov 112  }
 0x107   : > { %677 = vrot.lane.b32.xlu1 %v2797_v4, %s3846_s20  ;;  %675 = vrot.lane.b32.xlu0 %v2787_v2, %s3846_s20 }
 0x10b   : > { %685 = vrot.lane.b32.xlu1 %v2790_v3, %s3846_s20  ;;  %683 = vrot.lane.b32.xlu0 %v2784_v1, %s3846_s20 }
 0x10f   : > { %681 = vrot.lane.b32.xlu1 %v2810_v9, %s3846_s20  ;;  %679 = vrot.lane.b32.xlu0 %v2813_v10, %s3846_s20 }
 0x113   : > { %689 = vrot.lane.b32.xlu1 %v2802_v6, %s3846_s20  ;;  %687 = vrot.lane.b32.xlu0 %v2805_v7, %s3846_s20 }
 0x117   : > { %726 = vrot.lane.b32.xlu1 %v2797_v4, %s3844_s23  ;;  %724 = vrot.lane.b32.xlu0 %v2787_v2, %s3844_s23 }
 0x119   : > { %v388_v18 = vpop.permute.xlu1 %387  ;;  %v380_v19 = vpop.permute.xlu0 %379 }
 0x11a   : > { %v402_v23 = vsel %vm397_vm1, %v388_v18, %v380_v19  ;;  %v398_v24 = vsel %vm397_vm1, %v380_v19, %v388_v18  ;;  %v461_v19 = vld [vmem:[#allocation12 + $0x70] sm:$0xff] }
 0x11b   : > { %734 = vrot.lane.b32.xlu1 %v2790_v3, %s3844_s23  ;;  %732 = vrot.lane.b32.xlu0 %v2784_v1, %s3844_s23  ;;  %v414_v30 = vmul.f32 %v2940_v21, %v402_v23  ;;  %v415_v33 = vmul.f32 %v2942_v22, %v398_v24  ;;  %v2488_v1 = vmov 0   ;;  %v459_v23 = vld [vmem:[#allocation12 + $0x60] sm:$0xff]  ;;  %v460_v24 = vld [vmem:[#allocation12 + $0x68] sm:$0xff] }
 0x11c   : > { %2251 = vset.pattern.permute.xlu1 %v2488_v1  ;;  %2250 = vset.pattern.permute.xlu0 %v2488_v1  ;;  %v511_v1 = vld [vmem:[#allocation12 + $0xb8] sm:$0xff] }
 0x11d   : > { %v390_v28 = vpop.permute.xlu1 %389  ;;  %v382_v29 = vpop.permute.xlu0 %381 }
 0x11e   : > { %v399_v31 = vsel %vm397_vm1, %v382_v29, %v390_v28  ;;  %v403_v32 = vsel %vm397_vm1, %v390_v28, %v382_v29 }
 0x11f   : > { %v416_v34 = vmul.f32 %v2952_v25, %v403_v32  ;;  %v417_v35 = vmul.f32 %v2954_v26, %v399_v31  ;;  %730 = vrot.lane.b32.xlu1 %v2810_v9, %s3844_s23  ;;  %728 = vrot.lane.b32.xlu0 %v2813_v10, %s3844_s23 }
 0x121   : > { %v1998_v36 = vpack.c.bf16 %v416_v34, %v414_v30  ;;  %v386_v37 = vpop.permute.xlu1 %385  ;;  %v384_v38 = vpop.permute.xlu0 %383  ;;  %v1996_v39 = vpack.c.bf16 %v417_v35, %v415_v33 }
 0x123   : > { %738 = vrot.lane.b32.xlu1 %v2802_v6, %s3844_s23  ;;  %736 = vrot.lane.b32.xlu0 %v2805_v7, %s3844_s23  ;;  %s1828_s23 = scalar_lea.sflag [#allocation6], %s2761_s18 }
 0x124   : > { %1997 = vmatprep.subr.bf16.mxu0 %v1996_v39 }
 0x125   : > { %1999 = vmatpush1.bf16.msra.mxu0 %v1998_v36  ;;  %v394_v44 = vpop.permute.xlu1 %393  ;;  %v392_v45 = vpop.permute.xlu0 %391 }
 0x126   : > { %v401_v46 = vsel %vm397_vm1, %v386_v37, %v394_v44  ;;  %v405_v47 = vsel %vm397_vm1, %v394_v44, %v386_v37  ;;  %v400_v48 = vsel %vm397_vm1, %v384_v38, %v392_v45  ;;  %v404_v49 = vsel %vm397_vm1, %v392_v45, %v384_v38  ;;  %v3032_v44 = vld [vmem:[#allocation12 + $0x88] sm:$0xff] }
 0x127   : > { %v420_v50 = vmul.f32 %v412_v40, %v405_v47  ;;  %v421_v51 = vmul.f32 %v413_v41, %v401_v46  ;;  %v418_v52 = vmul.f32 %v410_v42, %v404_v49  ;;  %v419_v53 = vmul.f32 %v411_v43, %v400_v48  ;;  %1059 = vperm.xlu1 %2251, %v774_v59   ;;  %v3026_v41 = vld [vmem:[#allocation12 + $0x90] sm:$0xff]  ;;  %v3028_v42 = vld [vmem:[#allocation12 + $0x98] sm:$0xff]  ;;  %v3030_v43 = vld [vmem:[#allocation12 + $0x80] sm:$0xff] }
 0x128   : > { %1054 = vperm.xlu0 %2250, %v773_v60   ;;  %v510_v60 = vld [vmem:[#allocation12 + $0xb0] sm:$0xff] }
 0x129   : > { %v2002_v54 = vpack.c.bf16 %v420_v50, %v418_v52  ;;  %v433_v55 = vpop.permute.xlu1 %432  ;;  %v431_v56 = vpop.permute.xlu0 %430  ;;  %v2000_v57 = vpack.c.bf16 %v421_v51, %v419_v53 }
 0x12b   : > { %2001 = vmatprep.subr.bf16.mxu0 %v2000_v57  ;;  %1064 = vperm.xlu1 %2251, %v775_v8  }
 0x12c   : > { %2003 = vmatpush1.bf16.msra.mxu0 %v2002_v54  ;;  %1069 = vperm.xlu0 %2250, %v776_v13  }
 0x12d   : > { %v441_v2 = vpop.permute.xlu1 %440  ;;  %v439_v3 = vpop.permute.xlu0 %438 }
 0x12e   : > { %v448_v4 = vsel %vm446_vm2, %v433_v55, %v441_v2  ;;  %v452_v5 = vsel %vm446_vm2, %v441_v2, %v433_v55  ;;  %v447_v6 = vsel %vm446_vm2, %v431_v56, %v439_v3  ;;  %v451_v7 = vsel %vm446_vm2, %v439_v3, %v431_v56  ;;  %v3046_v2 = vld [vmem:[#allocation12 + $0xa0] sm:$0xff]  ;;  %v3048_v3 = vld [vmem:[#allocation12 + $0xa8] sm:$0xff] }
 0x12f   : > { %v465_v9 = vmul.f32 %v2985_v58, %v452_v5  ;;  %v466_v10 = vmul.f32 %v2993_v61, %v448_v4  ;;  %v463_v11 = vmul.f32 %v2995_v62, %v451_v7  ;;  %v464_v12 = vmul.f32 %v2997_v63, %v447_v6 }
 0x131   : > { %v2006_v14 = vpack.c.bf16 %v465_v9, %v463_v11  ;;  %v437_v15 = vpop.permute.xlu1 %436  ;;  %v435_v17 = vpop.permute.xlu0 %434  ;;  %v2004_v18 = vpack.c.bf16 %v466_v10, %v464_v12 }
 0x133   : > { %2005 = vmatprep.subr.bf16.mxu0 %v2004_v18 }
 0x134   : > { %2007 = vmatpush1.bf16.msra.mxu0 %v2006_v14 }
 0x135   : > { %v445_v27 = vpop.permute.xlu1 %444  ;;  %v443_v28 = vpop.permute.xlu0 %442 }
 0x136   : > { %v450_v29 = vsel %vm446_vm2, %v437_v15, %v445_v27  ;;  %v454_v30 = vsel %vm446_vm2, %v445_v27, %v437_v15  ;;  %v449_v31 = vsel %vm446_vm2, %v435_v17, %v443_v28  ;;  %v453_v32 = vsel %vm446_vm2, %v443_v28, %v435_v17 }
 0x137   : > { %v469_v33 = vmul.f32 %v461_v19, %v454_v30  ;;  %v470_v34 = vmul.f32 %v462_v20, %v450_v29  ;;  %v467_v35 = vmul.f32 %v459_v23, %v453_v32  ;;  %v468_v36 = vmul.f32 %v460_v24, %v449_v31  ;;  %v3061_v19 = vld [vmem:[#allocation12 + $0xd0] sm:$0xff]  ;;  %v3063_v20 = vld [vmem:[#allocation12 + $0xd8] sm:$0xff]  ;;  %v3065_v23 = vld [vmem:[#allocation12 + $0xc0] sm:$0xff] }
 0x138   : > { %v3067_v24 = vld [vmem:[#allocation12 + $0xc8] sm:$0xff] }
 0x139   : > { %v2010_v37 = vpack.c.bf16 %v469_v33, %v467_v35  ;;  %v482_v38 = vpop.permute.xlu1 %481  ;;  %v480_v39 = vpop.permute.xlu0 %479  ;;  %v2008_v40 = vpack.c.bf16 %v470_v34, %v468_v36 }
 0x13b   : > { %2009 = vmatprep.subr.bf16.mxu0 %v2008_v40 }
 0x13c   : > { %2011 = vmatpush1.bf16.msra.mxu0 %v2010_v37 }
 0x13d   : > { %v490_v45 = vpop.permute.xlu1 %489  ;;  %v488_v46 = vpop.permute.xlu0 %487 }
 0x13e   : > { %v497_v47 = vsel %vm495_vm3, %v482_v38, %v490_v45  ;;  %v501_v48 = vsel %vm495_vm3, %v490_v45, %v482_v38  ;;  %v496_v49 = vsel %vm495_vm3, %v480_v39, %v488_v46  ;;  %v500_v50 = vsel %vm495_vm3, %v488_v46, %v480_v39  ;;  %v559_v45 = vld [vmem:[#allocation12 + $0xf0] sm:$0xff]  ;;  %v560_v46 = vld [vmem:[#allocation12 + $0xf8] sm:$0xff] }
 0x13f   : > { %v514_v51 = vmul.f32 %v3026_v41, %v501_v48  ;;  %v515_v52 = vmul.f32 %v3028_v42, %v497_v47  ;;  %v512_v53 = vmul.f32 %v3030_v43, %v500_v50  ;;  %v513_v54 = vmul.f32 %v3032_v44, %v496_v49  ;;  %v3081_v47 = vld [vmem:[#allocation12 + $0xe0] sm:$0xff]  ;;  %v3083_v48 = vld [vmem:[#allocation12 + $0xe8] sm:$0xff] }
 0x141   : > { %v2014_v55 = vpack.c.bf16 %v514_v51, %v512_v53  ;;  %v486_v56 = vpop.permute.xlu1 %485  ;;  %v484_v57 = vpop.permute.xlu0 %483  ;;  %v2012_v59 = vpack.c.bf16 %v515_v52, %v513_v54 }
 0x143   : > { %2013 = vmatprep.subr.bf16.mxu0 %v2012_v59 }
 0x144   : > { %2015 = vmatpush1.bf16.msra.mxu0 %v2014_v55 }
 0x145   : > { %v494_v4 = vpop.permute.xlu1 %493  ;;  %v492_v5 = vpop.permute.xlu0 %491 }
 0x146   : > { %v499_v6 = vsel %vm495_vm3, %v486_v56, %v494_v4  ;;  %v503_v7 = vsel %vm495_vm3, %v494_v4, %v486_v56  ;;  %v498_v8 = vsel %vm495_vm3, %v484_v57, %v492_v5  ;;  %v502_v9 = vsel %vm495_vm3, %v492_v5, %v484_v57 }
 0x147   : > { %v518_v10 = vmul.f32 %v510_v60, %v503_v7  ;;  %v519_v11 = vmul.f32 %v511_v1, %v499_v6  ;;  %v516_v12 = vmul.f32 %v3046_v2, %v502_v9  ;;  %v517_v13 = vmul.f32 %v3048_v3, %v498_v8  ;;  %v3096_v6 = vld [vmem:[#allocation12 + $0x110] sm:$0xff]  ;;  %v3098_v7 = vld [vmem:[#allocation12 + $0x118] sm:$0xff]  ;;  %v3100_v8 = vld [vmem:[#allocation12 + $0x100] sm:$0xff] }
 0x148   : > { %v3102_v9 = vld [vmem:[#allocation12 + $0x108] sm:$0xff] }
 0x149   : > { %v2018_v14 = vpack.c.bf16 %v518_v10, %v516_v12  ;;  %v531_v15 = vpop.permute.xlu1 %530  ;;  %v529_v17 = vpop.permute.xlu0 %528  ;;  %v2016_v18 = vpack.c.bf16 %v519_v11, %v517_v13 }
 0x14b   : > { %2017 = vmatprep.subr.bf16.mxu0 %v2016_v18 }
 0x14c   : > { %2019 = vmatpush1.bf16.msra.mxu0 %v2018_v14 }
 0x14d   : > { %v539_v27 = vpop.permute.xlu1 %538  ;;  %v537_v28 = vpop.permute.xlu0 %536 }
 0x14e   : > { %v546_v29 = vsel %vm544_vm4, %v531_v15, %v539_v27  ;;  %v550_v30 = vsel %vm544_vm4, %v539_v27, %v531_v15  ;;  %v545_v31 = vsel %vm544_vm4, %v529_v17, %v537_v28  ;;  %v549_v32 = vsel %vm544_vm4, %v537_v28, %v529_v17 }
 0x14f   : > { %v563_v33 = vmul.f32 %v3061_v19, %v550_v30  ;;  %v564_v34 = vmul.f32 %v3063_v20, %v546_v29  ;;  %v561_v35 = vmul.f32 %v3065_v23, %v549_v32  ;;  %v562_v36 = vmul.f32 %v3067_v24, %v545_v31 }
 0x151   : > { %v2022_v37 = vpack.c.bf16 %v563_v33, %v561_v35  ;;  %v535_v38 = vpop.permute.xlu1 %534  ;;  %v533_v39 = vpop.permute.xlu0 %532  ;;  %v2020_v40 = vpack.c.bf16 %v564_v34, %v562_v36  ;;  %v608_v33 = vld [vmem:[#allocation12 + $0x130] sm:$0xff]  ;;  %v609_v34 = vld [vmem:[#allocation12 + $0x138] sm:$0xff]  ;;  %v3116_v35 = vld [vmem:[#allocation12 + $0x120] sm:$0xff] }
 0x152   : > { %v3118_v36 = vld [vmem:[#allocation12 + $0x128] sm:$0xff] }
 0x153   : > { %2021 = vmatprep.subr.bf16.mxu0 %v2020_v40 }
 0x154   : > { %2023 = vmatpush1.bf16.msra.mxu0 %v2022_v37 }
 0x155   : > { %v543_v49 = vpop.permute.xlu1 %542  ;;  %v541_v50 = vpop.permute.xlu0 %540 }
 0x156   : > { %v548_v51 = vsel %vm544_vm4, %v535_v38, %v543_v49  ;;  %v552_v52 = vsel %vm544_vm4, %v543_v49, %v535_v38  ;;  %v547_v53 = vsel %vm544_vm4, %v533_v39, %v541_v50  ;;  %v551_v54 = vsel %vm544_vm4, %v541_v50, %v533_v39 }
 0x157   : > { %v567_v55 = vmul.f32 %v559_v45, %v552_v52  ;;  %v568_v56 = vmul.f32 %v560_v46, %v548_v51  ;;  %v565_v57 = vmul.f32 %v3081_v47, %v551_v54  ;;  %v566_v59 = vmul.f32 %v3083_v48, %v547_v53 }
 0x159   : > { %v2026_v60 = vpack.c.bf16 %v567_v55, %v565_v57  ;;  %v580_v1 = vpop.permute.xlu1 %579  ;;  %v578_v4 = vpop.permute.xlu0 %577  ;;  %v2024_v5 = vpack.c.bf16 %v568_v56, %v566_v59  ;;  %v3131_v57 = vld [vmem:[#allocation12 + $0x150] sm:$0xff]  ;;  %v3133_v59 = vld [vmem:[#allocation12 + $0x158] sm:$0xff] }
 0x15b   : > { %2025 = vmatprep.subr.bf16.mxu0 %v2024_v5 }
 0x15c   : > { %2027 = vmatpush1.bf16.msra.mxu0 %v2026_v60  ;;  %v3135_v60 = vld [vmem:[#allocation12 + $0x140] sm:$0xff] }
 0x15d   : > { %v588_v10 = vpop.permute.xlu1 %587  ;;  %v586_v11 = vpop.permute.xlu0 %585 }
 0x15e   : > { %v595_v12 = vsel %vm593_vm5, %v580_v1, %v588_v10  ;;  %v599_v13 = vsel %vm593_vm5, %v588_v10, %v580_v1  ;;  %v594_v14 = vsel %vm593_vm5, %v578_v4, %v586_v11  ;;  %v598_v15 = vsel %vm593_vm5, %v586_v11, %v578_v4  ;;  %v3137_v1 = vld [vmem:[#allocation12 + $0x148] sm:$0xff] }
 0x15f   : > { %v612_v17 = vmul.f32 %v3096_v6, %v595_v12  ;;  %v613_v18 = vmul.f32 %v3098_v7, %v599_v13  ;;  %v610_v27 = vmul.f32 %v3100_v8, %v594_v14  ;;  %v611_v28 = vmul.f32 %v3102_v9, %v598_v15 }
 0x161   : > { %v2030_v29 = vpack.c.bf16 %v612_v17, %v610_v27  ;;  %v584_v30 = vpop.permute.xlu1 %583  ;;  %v582_v31 = vpop.permute.xlu0 %581  ;;  %v2028_v32 = vpack.c.bf16 %v613_v18, %v611_v28 }
 0x163   : > { %2029 = vmatprep.subr.bf16.mxu0 %v2028_v32  ;;  %v3153_v32 = vld [vmem:[#allocation12 + $0x178] sm:$0xff] }
 0x164   : > { %2031 = vmatpush1.bf16.msra.mxu0 %v2030_v29 }
 0x165   : > { %v592_v37 = vpop.permute.xlu1 %591  ;;  %v590_v38 = vpop.permute.xlu0 %589 }
 0x166   : > { %v597_v39 = vsel %vm593_vm5, %v584_v30, %v592_v37  ;;  %v601_v40 = vsel %vm593_vm5, %v592_v37, %v584_v30  ;;  %v596_v45 = vsel %vm593_vm5, %v582_v31, %v590_v38  ;;  %v600_v46 = vsel %vm593_vm5, %v590_v38, %v582_v31  ;;  %v3151_v31 = vld [vmem:[#allocation12 + $0x170] sm:$0xff] }
 0x167   : > { %v616_v49 = vmul.f32 %v608_v33, %v597_v39  ;;  %v617_v50 = vmul.f32 %v609_v34, %v601_v40  ;;  %v614_v51 = vmul.f32 %v3116_v35, %v596_v45  ;;  %v615_v52 = vmul.f32 %v3118_v36, %v600_v46  ;;  %v3155_v33 = vld [vmem:[#allocation12 + $0x160] sm:$0xff]  ;;  %v3157_v34 = vld [vmem:[#allocation12 + $0x168] sm:$0xff] }
 0x169   : > { %v2034_v53 = vpack.c.bf16 %v616_v49, %v614_v51  ;;  %v629_v54 = vpop.permute.xlu1 %628  ;;  %v627_v55 = vpop.permute.xlu0 %626  ;;  %v2032_v56 = vpack.c.bf16 %v617_v50, %v615_v52 }
 0x16b   : > { %2033 = vmatprep.subr.bf16.mxu0 %v2032_v56 }
 0x16c   : > { %2035 = vmatpush1.bf16.msra.mxu0 %v2034_v53 }
 0x16d   : > { %v637_v4 = vpop.permute.xlu1 %636  ;;  %v635_v5 = vpop.permute.xlu0 %634 }
 0x16e   : > { %v644_v10 = vsel %vm642_vm6, %v629_v54, %v637_v4  ;;  %v648_v11 = vsel %vm642_vm6, %v637_v4, %v629_v54  ;;  %v643_v12 = vsel %vm642_vm6, %v627_v55, %v635_v5  ;;  %v647_v13 = vsel %vm642_vm6, %v635_v5, %v627_v55  ;;  %v3172_v4 = vld [vmem:[#allocation12 + $0x190] sm:$0xff]  ;;  %v3174_v5 = vld [vmem:[#allocation12 + $0x198] sm:$0xff] }
 0x16f   : > { %v661_v14 = vmul.f32 %v3131_v57, %v644_v10  ;;  %v662_v15 = vmul.f32 %v3133_v59, %v648_v11  ;;  %v659_v17 = vmul.f32 %v3135_v60, %v643_v12  ;;  %v660_v18 = vmul.f32 %v3137_v1, %v647_v13  ;;  %3886 = vst [vmem:[#allocation18_spill] sm:$0xff] %v3172_v4  ;;  %v3176_v10 = vld [vmem:[#allocation12 + $0x180] sm:$0xff]  ;;  %v3178_v11 = vld [vmem:[#allocation12 + $0x188] sm:$0xff] }
 0x170   : > { %3887 = vst [vmem:[#allocation19_spill] sm:$0xff] %v3176_v10 }
 0x171   : > { %v2038_v27 = vpack.c.bf16 %v661_v14, %v659_v17  ;;  %v633_v28 = vpop.permute.xlu1 %632  ;;  %v631_v29 = vpop.permute.xlu0 %630  ;;  %v2036_v30 = vpack.c.bf16 %v662_v15, %v660_v18 }
 0x173   : > { %2037 = vmatprep.subr.bf16.mxu0 %v2036_v30 }
 0x174   : > { %2039 = vmatpush1.bf16.msra.mxu0 %v2038_v27 }
 0x175   : > { %v641_v37 = vpop.permute.xlu1 %640  ;;  %v639_v38 = vpop.permute.xlu0 %638 }
 0x176   : > { %v646_v39 = vsel %vm642_vm6, %v633_v28, %v641_v37  ;;  %v650_v40 = vsel %vm642_vm6, %v641_v37, %v633_v28  ;;  %v645_v45 = vsel %vm642_vm6, %v631_v29, %v639_v38  ;;  %v649_v46 = vsel %vm642_vm6, %v639_v38, %v631_v29 }
 0x177   : > { %v665_v49 = vmul.f32 %v3151_v31, %v646_v39  ;;  %v666_v50 = vmul.f32 %v3153_v32, %v650_v40  ;;  %v663_v51 = vmul.f32 %v3155_v33, %v645_v45  ;;  %v664_v52 = vmul.f32 %v3157_v34, %v649_v46  ;;  %v3192_v45 = vld [vmem:[#allocation12 + $0x1b0] sm:$0xff]  ;;  %v3194_v46 = vld [vmem:[#allocation12 + $0x1b8] sm:$0xff] }
 0x178   : > { %3888 = vst [vmem:[#allocation20_spill] sm:$0xff] %v3192_v45  ;;  %3889 = vst [vmem:[#allocation21_spill] sm:$0xff] %v3194_v46 }
 0x179   : > { %v2042_v53 = vpack.c.bf16 %v665_v49, %v663_v51  ;;  %v678_v54 = vpop.permute.xlu1 %677  ;;  %v676_v55 = vpop.permute.xlu0 %675  ;;  %v2040_v56 = vpack.c.bf16 %v666_v50, %v664_v52  ;;  %v3196_v49 = vld [vmem:[#allocation12 + $0x1a0] sm:$0xff]  ;;  %v3198_v50 = vld [vmem:[#allocation12 + $0x1a8] sm:$0xff] }
 0x17a   : > { %3890 = vst [vmem:[#allocation22_spill] sm:$0xff] %v3196_v49  ;;  %3891 = vst [vmem:[#allocation23_spill] sm:$0xff] %v3198_v50 }
 0x17b   : > { %2041 = vmatprep.subr.bf16.mxu0 %v2040_v56 }
 0x17c   : > { %2043 = vmatpush1.bf16.msra.mxu0 %v2042_v53 }
 0x17d   : > { %v686_v12 = vpop.permute.xlu1 %685  ;;  %v684_v13 = vpop.permute.xlu0 %683 }
 0x17e   : > { %v693_v14 = vsel %vm691_vm7, %v678_v54, %v686_v12  ;;  %v697_v15 = vsel %vm691_vm7, %v686_v12, %v678_v54  ;;  %v692_v17 = vsel %vm691_vm7, %v676_v55, %v684_v13  ;;  %v696_v18 = vsel %vm691_vm7, %v684_v13, %v676_v55 }
 0x17f   : > { %v710_v27 = vmul.f32 %v3172_v4, %v693_v14  ;;  %v711_v28 = vmul.f32 %v3174_v5, %v697_v15  ;;  %v708_v29 = vmul.f32 %v3176_v10, %v692_v17  ;;  %v709_v30 = vmul.f32 %v3178_v11, %v696_v18 }
 0x181   : > { %v2046_v37 = vpack.c.bf16 %v710_v27, %v708_v29  ;;  %v682_v38 = vpop.permute.xlu1 %681  ;;  %v680_v39 = vpop.permute.xlu0 %679  ;;  %v2044_v40 = vpack.c.bf16 %v711_v28, %v709_v30  ;;  %v3213_v29 = vld [vmem:[#allocation12 + $0x1d0] sm:$0xff]  ;;  %v3215_v30 = vld [vmem:[#allocation12 + $0x1d8] sm:$0xff] }
 0x182   : > { %3892 = vst [vmem:[#allocation24_spill] sm:$0xff] %v3213_v29  ;;  %3893 = vst [vmem:[#allocation25_spill] sm:$0xff] %v3215_v30 }
 0x183   : > { %2045 = vmatprep.subr.bf16.mxu0 %v2044_v40 }
 0x184   : > { %2047 = vmatpush1.bf16.msra.mxu0 %v2046_v37  ;;  %v3217_v37 = vld [vmem:[#allocation12 + $0x1c0] sm:$0xff] }
 0x185   : > { %v690_v51 = vpop.permute.xlu1 %689  ;;  %v688_v52 = vpop.permute.xlu0 %687  ;;  %3894 = vst [vmem:[#allocation26_spill] sm:$0xff] %v3217_v37 }
 0x186   : > { %v695_v53 = vsel %vm691_vm7, %v682_v38, %v690_v51  ;;  %v699_v54 = vsel %vm691_vm7, %v690_v51, %v682_v38  ;;  %v694_v55 = vsel %vm691_vm7, %v680_v39, %v688_v52  ;;  %v698_v56 = vsel %vm691_vm7, %v688_v52, %v680_v39  ;;  %v3219_v38 = vld [vmem:[#allocation12 + $0x1c8] sm:$0xff] }
 0x187   : > { %v714_v12 = vmul.f32 %v3192_v45, %v695_v53  ;;  %v715_v13 = vmul.f32 %v3194_v46, %v699_v54  ;;  %v712_v14 = vmul.f32 %v3196_v49, %v694_v55  ;;  %v713_v15 = vmul.f32 %v3198_v50, %v698_v56  ;;  %3895 = vst [vmem:[#allocation27_spill] sm:$0xff] %v3219_v38 }
 0x189   : > { %v2050_v17 = vpack.c.bf16 %v714_v12, %v712_v14  ;;  %v727_v18 = vpop.permute.xlu1 %726  ;;  %v725_v27 = vpop.permute.xlu0 %724  ;;  %v2048_v28 = vpack.c.bf16 %v715_v13, %v713_v15 }
 0x18b   : > { %2049 = vmatprep.subr.bf16.mxu0 %v2048_v28 }
 0x18c   : > { %2051 = vmatpush1.bf16.msra.mxu0 %v2050_v17 }
 0x18d   : > { %v735_v39 = vpop.permute.xlu1 %734  ;;  %v733_v40 = vpop.permute.xlu0 %732 }
 0x18e   : > { %v742_v51 = vsel %vm740_vm8, %v727_v18, %v735_v39  ;;  %v746_v52 = vsel %vm740_vm8, %v735_v39, %v727_v18  ;;  %v741_v53 = vsel %vm740_vm8, %v725_v27, %v733_v40  ;;  %v745_v54 = vsel %vm740_vm8, %v733_v40, %v725_v27  ;;  %v3233_v18 = vld [vmem:[#allocation12 + $0x1f0] sm:$0xff]  ;;  %v3235_v39 = vld [vmem:[#allocation12 + $0x1f8] sm:$0xff]  ;;  %v3239_v27 = vld [vmem:[#allocation12 + $0x1e8] sm:$0xff] }
 0x18f   : > { %v759_v55 = vmul.f32 %v3213_v29, %v742_v51  ;;  %v760_v56 = vmul.f32 %v3215_v30, %v746_v52  ;;  %v757_v12 = vmul.f32 %v3217_v37, %v741_v53  ;;  %v758_v13 = vmul.f32 %v3219_v38, %v745_v54  ;;  %3896 = vst [vmem:[#allocation28_spill] sm:$0xff] %v3233_v18 }
 0x190   : > { %3897 = vst [vmem:[#allocation29_spill] sm:$0xff] %v3235_v39  ;;  %3899 = vst [vmem:[#allocation31_spill] sm:$0xff] %v3239_v27 }
 0x191   : > { %v2054_v14 = vpack.c.bf16 %v759_v55, %v757_v12  ;;  %v731_v15 = vpop.permute.xlu1 %730  ;;  %v729_v17 = vpop.permute.xlu0 %728  ;;  %v2052_v28 = vpack.c.bf16 %v760_v56, %v758_v13 }
 0x193   : > { %2053 = vmatprep.subr.bf16.mxu0 %v2052_v28 }
 0x194   : > { %2055 = vmatpush1.bf16.msra.mxu0 %v2054_v14 }
 0x195   : > { %v739_v40 = vpop.permute.xlu1 %738  ;;  %v737_v51 = vpop.permute.xlu0 %736 }
 0x196   : > { %v744_v52 = vsel %vm740_vm8, %v731_v15, %v739_v40  ;;  %v748_v53 = vsel %vm740_vm8, %v739_v40, %v731_v15  ;;  %v743_v54 = vsel %vm740_vm8, %v729_v17, %v737_v51  ;;  %v747_v55 = vsel %vm740_vm8, %v737_v51, %v729_v17  ;;  %v777_v15 = vld [vmem:[%s3827_s2] sm:$0xff]  ;;  %v780_v17 = vld [vmem:[%s3827_s2 + $0x18] sm:$0xff]  ;;  %v779_v40 = vld [vmem:[%s3827_s2 + $0x10] sm:$0xff] }
 0x197   : > { %v763_v56 = vmul.f32 %v3233_v18, %v744_v52  ;;  %v764_v12 = vmul.f32 %v3235_v39, %v748_v53  ;;  %v761_v13 = vmul.f32 %v3237_v0, %v743_v54  ;;  %v762_v14 = vmul.f32 %v3239_v27, %v747_v55  ;;  %v782_v51 = vld [vmem:[%s3827_s2 + $0x28] sm:$0xff]  ;;  %v784_v52 = vld [vmem:[%s3827_s2 + $0x38] sm:$0xff]  ;;  %v783_v53 = vld [vmem:[%s3827_s2 + $0x30] sm:$0xff] }
 0x199   : > { %v2058_v28 = vpack.c.bf16 %v763_v56, %v761_v13  ;;  %v2056_v29 = vpack.c.bf16 %v764_v12, %v762_v14 }
 0x19b   : > { %2057 = vmatprep.subr.bf16.mxu0 %v2056_v29  ;;  %v781_v29 = vld [vmem:[%s3827_s2 + $0x20] sm:$0xff] }
 0x19c   : > { %2059 = vmatpush1.bf16.msra.mxu0 %v2058_v28 }
 0x19f   : > { %1028 = vmatmul.mubr.f32.vlgmr.msra.gmra.mrb[0].mxu0 %v777_v15 }
 0x1a0   : > { %1033 = vmatprep.mubr.f32.mxu0 %v780_v17 }
 0x1a3   : > { %1034 = vmatmul.mubr.f32.gmra.mrb[2].mxu0 %v779_v40 }
 0x1a4   : > { %1039 = vmatprep.mubr.f32.mxu0 %v782_v51 }
 0x1a6   : > { %v1060_v14 = vpop.permute.xlu1 %1059 }
 0x1a7   : > { %1040 = vmatmul.mubr.f32.gmra.mrb[4].mxu0 %v781_v29  ;;  %v1055_v54 = vpop.permute.xlu0 %1054 }
 0x1a8   : > { %1045 = vmatprep.mubr.f32.mxu0 %v784_v52 }
 0x1ab   : > { %1046 = vmatmul.mubr.f32.gmra.mrb[6].mxu0 %v783_v53 }
 0x272   : > { %v1029_v55 = vpop.f32.mrb[0].mxu0 }
 0x273   : > { %v1072_v56 = vadd.f32 %v1055_v54, %v1029_v55  ;;  %v1031_v12 = vpop.f32.mrb[1].mxu0 }
 0x274   : > { %v1073_v28 = vadd.f32 %v1055_v54, %v1031_v12  ;;  %v1070_v12 = vpop.permute.xlu0 %1069 }
 0x275   : > { %v3274_v13 = vmax.f32 %v1072_v56, 0.0  ;;  %v1065_v56 = vpop.permute.xlu1 %1064 }
 0x276   : > { %v1035_v15 = vpop.f32.mrb[2].mxu0  ;;  %v3280_v52 = vmax.f32 %v1073_v28, 0.0 }
 0x277   : > { %v1074_v17 = vadd.f32 %v1060_v14, %v1035_v15  ;;  %1104 = vrot.lane.b32.xlu1 %v3274_v13, %s2480_s30  ;;  %v1037_v40 = vpop.f32.mrb[3].mxu0 }
 0x278   : > { %v1075_v51 = vadd.f32 %v1060_v14, %v1037_v40 }
 0x279   : > { %v3278_v29 = vmax.f32 %v1074_v17, 0.0 }
 0x27a   : > { %v3282_v53 = vmax.f32 %v1075_v51, 0.0  ;;  %v1041_v39 = vpop.f32.mrb[4].mxu0 }
 0x27b   : > { %1152 = vrot.lane.b32.xlu1 %v3274_v13, %s2481_s9  ;;  %1106 = vrot.lane.b32.xlu0 %v3278_v29, %s2480_s30  ;;  %v1043_v54 = vpop.f32.mrb[5].mxu0  ;;  %v2062_v28 = vpack.c.bf16 %v3278_v29, %v3274_v13  ;;  %v1076_v51 = vadd.f32 %v1065_v56, %v1041_v39 }
 0x27c   : > { %v2060_v55 = vpack.c.bf16 %v3282_v53, %v3280_v52  ;;  %v1077_v14 = vadd.f32 %v1065_v56, %v1043_v54  ;;  %v3903_v56 = vmov 0.0  }
 0x27e   : > { %v1047_v15 = vpop.f32.mrb[6].mxu0  ;;  %2061 = vmatprep.subr.bf16.mxu1 %v2060_v55  ;;  %v3296_v27 = vmax.f32 %v1077_v14, 0.0  ;;  %v3306_v55 = vmax.f32 %v1076_v51, 0.0 }
 0x27f   : > { %v1078_v17 = vadd.f32 %v1070_v12, %v1047_v15  ;;  %1200 = vrot.lane.b32.xlu1 %v3274_v13, %s2482_s15  ;;  %1154 = vrot.lane.b32.xlu0 %v3278_v29, %s2481_s9  ;;  %v1049_v40 = vpop.f32.mrb[7].mxu0 }
 0x280   : > { %v1079_v18 = vadd.f32 %v1070_v12, %v1049_v40  ;;  %2063 = vmatpush1.bf16.msra.mxu1 %v2062_v28  ;;  %v1566_v12 = vld [vmem:[#allocation9 + $0x8] sm:$0xff]  ;;  %v1567_v28 = vld [vmem:[#allocation9 + $0x10] sm:$0xff] }
 0x281   : > { %v3298_v0 = vmax.f32 %v1078_v17, 0.0  ;;  %v1568_v17 = vld [vmem:[#allocation9 + $0x18] sm:$0xff] }
 0x282   : > { %v3300_v54 = vmax.f32 %v1079_v18, 0.0  ;;  %v1565_v18 = vld [vmem:[#allocation9] sm:$0xff] }
 0x283   : > { %1248 = vrot.lane.b32.xlu1 %v3274_v13, %s3900_s16  ;;  %1202 = vrot.lane.b32.xlu0 %v3278_v29, %s2482_s15  ;;  %v2066_v39 = vpack.c.bf16 %v3298_v0, %v3306_v55 }
 0x284   : > { %v2064_v15 = vpack.c.bf16 %v3300_v54, %v3296_v27 }
 0x286   : > { %2065 = vmatprep.subr.bf16.mxu1 %v2064_v15 }
 0x287   : > { %1296 = vrot.lane.b32.xlu1 %v3274_v13, %s3901_s13  ;;  %1250 = vrot.lane.b32.xlu0 %v3278_v29, %s3900_s16 }
 0x288   : > { %2067 = vmatpush1.bf16.msra.mxu1 %v2066_v39  ;;  %v1975_v39 = vld [vmem:[%s3830_s5 + $0x30] sm:$0xff] }
 0x28b   : > { %1344 = vrot.lane.b32.xlu1 %v3274_v13, %s3902_s17  ;;  %1298 = vrot.lane.b32.xlu0 %v3278_v29, %s3901_s13 }
 0x28c   : > { %1977 = vmatmul.mubr.msk.f32.vlgmr.msra.gmra.mrb[0].mxu1 %vm861_vm0, %v1565_v18 }
 0x28d   : > { %1659 = vmatprep.mubr.f32.mxu1 %v3903_v56 }
 0x28f   : > { %1112 = vrot.lane.b32.xlu1 %v3280_v52, %s2480_s30  ;;  %1346 = vrot.lane.b32.xlu0 %v3278_v29, %s3902_s17 }
 0x290   : > { %1978 = vmatmul.mubr.msk.f32.gmra.mrb[2].mxu1 %vm861_vm0, %v1566_v12 }
 0x291   : > { %1665 = vmatprep.mubr.f32.mxu1 %v3903_v56 }
 0x293   : > { %1160 = vrot.lane.b32.xlu1 %v3280_v52, %s2481_s9  ;;  %1114 = vrot.lane.b32.xlu0 %v3282_v53, %s2480_s30 }
 0x294   : > { %1979 = vmatmul.mubr.msk.f32.gmra.mrb[4].mxu1 %vm861_vm0, %v1567_v28 }
 0x295   : > { %1671 = vmatprep.mubr.f32.mxu1 %v3903_v56  ;;  %v1976_v56 = vld [vmem:[%s3830_s5 + $0x38] sm:$0xff] }
 0x297   : > { %1208 = vrot.lane.b32.xlu1 %v3280_v52, %s2482_s15  ;;  %1162 = vrot.lane.b32.xlu0 %v3282_v53, %s2481_s9 }
 0x298   : > { %1980 = vmatmul.mubr.msk.f32.gmra.mrb[6].mxu1 %vm861_vm0, %v1568_v17 }
 0x29b   : > { %1256 = vrot.lane.b32.xlu1 %v3280_v52, %s3900_s16  ;;  %1210 = vrot.lane.b32.xlu0 %v3282_v53, %s2482_s15 }
 0x29f   : > { %1304 = vrot.lane.b32.xlu1 %v3280_v52, %s3901_s13  ;;  %1258 = vrot.lane.b32.xlu0 %v3282_v53, %s3900_s16 }
 0x2a3   : > { %1352 = vrot.lane.b32.xlu1 %v3280_v52, %s3902_s17  ;;  %1306 = vrot.lane.b32.xlu0 %v3282_v53, %s3901_s13 }
 0x2a7   : > { %1354 = vrot.lane.b32.xlu0 %v3282_v53, %s3902_s17  ;;  %1108 = vrot.lane.b32.xlu1 %v3306_v55, %s2480_s30 }
 0x2ab   : > { %1156 = vrot.lane.b32.xlu1 %v3306_v55, %s2481_s9  ;;  %1110 = vrot.lane.b32.xlu0 %v3298_v0, %s2480_s30 }
 0x2af   : > { %1204 = vrot.lane.b32.xlu1 %v3306_v55, %s2482_s15  ;;  %1158 = vrot.lane.b32.xlu0 %v3298_v0, %s2481_s9 }
 0x2b3   : > { %1252 = vrot.lane.b32.xlu1 %v3306_v55, %s3900_s16  ;;  %1206 = vrot.lane.b32.xlu0 %v3298_v0, %s2482_s15 }
 0x2b7   : > { %1300 = vrot.lane.b32.xlu1 %v3306_v55, %s3901_s13  ;;  %1254 = vrot.lane.b32.xlu0 %v3298_v0, %s3900_s16 }
 0x2bb   : > { %1116 = vrot.lane.b32.xlu1 %v3296_v27, %s2480_s30  ;;  %1302 = vrot.lane.b32.xlu0 %v3298_v0, %s3901_s13 }
 0x2bf   : > { %1348 = vrot.lane.b32.xlu1 %v3306_v55, %s3902_s17  ;;  %1118 = vrot.lane.b32.xlu0 %v3300_v54, %s2480_s30  ;;  %s3905_s30 = smov 111  }
 0x2c3   : > { %1164 = vrot.lane.b32.xlu1 %v3296_v27, %s2481_s9  ;;  %1350 = vrot.lane.b32.xlu0 %v3298_v0, %s3902_s17 }
 0x2c7   : > { %1212 = vrot.lane.b32.xlu1 %v3296_v27, %s2482_s15  ;;  %1166 = vrot.lane.b32.xlu0 %v3300_v54, %s2481_s9 }
 0x2cb   : > { %1260 = vrot.lane.b32.xlu1 %v3296_v27, %s3900_s16  ;;  %1394 = vrot.lane.b32.xlu0 %v3278_v29, %s3904_s1 }
 0x2cf   : > { %1308 = vrot.lane.b32.xlu1 %v3296_v27, %s3901_s13  ;;  %1214 = vrot.lane.b32.xlu0 %v3300_v54, %s2482_s15 }
 0x2d3   : > { %1356 = vrot.lane.b32.xlu1 %v3296_v27, %s3902_s17  ;;  %1402 = vrot.lane.b32.xlu0 %v3282_v53, %s3904_s1 }
 0x2d7   : > { %1392 = vrot.lane.b32.xlu1 %v3274_v13, %s3904_s1  ;;  %1262 = vrot.lane.b32.xlu0 %v3300_v54, %s3900_s16 }
 0x2db   : > { %1400 = vrot.lane.b32.xlu1 %v3280_v52, %s3904_s1  ;;  %1398 = vrot.lane.b32.xlu0 %v3298_v0, %s3904_s1 }
 0x2df   : > { %1396 = vrot.lane.b32.xlu1 %v3306_v55, %s3904_s1  ;;  %1310 = vrot.lane.b32.xlu0 %v3300_v54, %s3901_s13  ;;  %s3930_s13 = sshll.u32 %s2761_s18, 6 }
 0x2e3   : > { %1404 = vrot.lane.b32.xlu1 %v3296_v27, %s3904_s1  ;;  %1442 = vrot.lane.b32.xlu0 %v3278_v29, %s3905_s30 }
 0x2e7   : > { %1440 = vrot.lane.b32.xlu1 %v3274_v13, %s3905_s30  ;;  %1358 = vrot.lane.b32.xlu0 %v3300_v54, %s3902_s17  ;;  %s3759_s17 = scalar_lea.vmem [#allocation13], %s3930_s13 }
 0x2e9   : > { %v1105_v14 = vpop.permute.xlu1 %1104 }
 0x2eb   : > { %1448 = vrot.lane.b32.xlu1 %v3280_v52, %s3905_s30  ;;  %1450 = vrot.lane.b32.xlu0 %v3282_v53, %s3905_s30  ;;  %v1494_v52 = vld [vmem:[#allocation10 + $0x8] sm:$0xff]  ;;  %v1973_v53 = vld [vmem:[%s3830_s5 + $0x20] sm:$0xff] }
 0x2ec   : > { %1742 = vmatprep.mubr.f32.mxu1 %v1494_v52 }
 0x2ed   : > { %v1153_v29 = vpop.permute.xlu1 %1152  ;;  %v1107_v13 = vpop.permute.xlu0 %1106 }
 0x2ef   : > { %1444 = vrot.lane.b32.xlu1 %v3306_v55, %s3905_s30  ;;  %1406 = vrot.lane.b32.xlu0 %v3300_v54, %s3904_s1  ;;  %s1841_s1 = sshll.u32 %s3759_s17, 4  ;;  %s3773_s1 = int_to_ptr.vmem [resolvable:$true] %s1841_s1 }
 0x2f0   : > { %s2394_s14 = scalar_lea.vmem %s3773_s1, 1024 }
 0x2f1   : > { %v1201_v40 = vpop.permute.xlu1 %1200  ;;  %v1155_v51 = vpop.permute.xlu0 %1154  ;;  %p2395_p10 = scmp.ne.s32.totalorder %s3773_s1, %s2394_s14 }
 0x2f3   : > { %1452 = vrot.lane.b32.xlu1 %v3296_v27, %s3905_s30  ;;  %1446 = vrot.lane.b32.xlu0 %v3298_v0, %s3905_s30  ;;  %v1974_v27 = vld [vmem:[%s3830_s5 + $0x28] sm:$0xff]  ;;  %p2396_p5 = pnand %p2395_p10, %p2709_p3 }
 0x2f5   : > { %v1249_v55 = vpop.permute.xlu1 %1248  ;;  %v1203_v15 = vpop.permute.xlu0 %1202  ;;  %p2397_p7 = pneg %p2396_p5 }
 0x2f7   : > { %1769 = vperm.xlu1 %2251, %v1973_v53   ;;  %1454 = vrot.lane.b32.xlu0 %v3300_v54, %s3905_s30  ;;  %s1987_s30 = sshll.u32 %s2552_s28, 10  ;;  %s2489_s28 = smov [#allocation13]  }
 0x2f8   : > { %s2398_s19 = sshll.u32 %s2489_s28, 4  ;;  %s2399_s19 = int_to_ptr.vmem [resolvable:$false] %s2398_s19 }
 0x2f9   : > { %v1297_v18 = vpop.permute.xlu1 %1296  ;;  %v1251_v0 = vpop.permute.xlu0 %1250  ;;  %s2400_s11 = scalar_lea.vmem %s2399_s19, 2048  ;;  %p2401_p12 = scmp.lt.s32.totalorder %s3773_s1, %s2399_s19 }
 0x2fa   : > { %p2402_p1 = scmp.lt.s32.totalorder %s2400_s11, %s2394_s14 }
 0x2fb   : > { %1779 = vperm.xlu1 %2251, %v1975_v39   ;;  %1774 = vperm.xlu0 %2250, %v1974_v27  }
 0x2fc   : > { %p2403_p2 = por %p2402_p1, %p2401_p12 }
 0x2fd   : > { %v3445_v12 = vpop.permute.xlu1 %1344  ;;  %v1299_v28 = vpop.permute.xlu0 %1298 }
 0x2fe   : > { %p2404_p13 = pnand %p2403_p2, %p2397_p7 }
 0x2ff   : > { %1784 = vperm.xlu0 %2250, %v1976_v56  }
 0x301   : > { %v1113_v54 = vpop.permute.xlu1 %1112  ;;  %v3447_v17 = vpop.permute.xlu0 %1346 }
 0x302   : > { %v1120_v52 = vsel %vm397_vm1, %v1105_v14, %v1113_v54  ;;  %v1124_v53 = vsel %vm397_vm1, %v1113_v54, %v1105_v14 }
 0x303   : > { %v1136_v45 = vmul.f32 %v1124_v53, %v2940_v21  ;;  %v1137_v56 = vmul.f32 %v1120_v52, %v2942_v22 }
 0x305   : > { %v1161_v37 = vpop.permute.xlu1 %1160  ;;  %v1115_v39 = vpop.permute.xlu0 %1114 }
 0x306   : > { %v1121_v27 = vsel %vm397_vm1, %v1107_v13, %v1115_v39  ;;  %v1125_v46 = vsel %vm397_vm1, %v1115_v39, %v1107_v13  ;;  %v1168_v50 = vsel %vm446_vm2, %v1153_v29, %v1161_v37  ;;  %v1172_v14 = vsel %vm446_vm2, %v1161_v37, %v1153_v29 }
 0x307   : > { %v1138_v30 = vmul.f32 %v1125_v46, %v2952_v25  ;;  %v1139_v38 = vmul.f32 %v1121_v27, %v2954_v26  ;;  %v3470_v22 = vmul.f32 %v1172_v14, %v2995_v62  ;;  %v3473_v25 = vmul.f32 %v1168_v50, %v2997_v63 }
 0x309   : > { %v2070_v54 = vpack.c.bf16 %v1138_v30, %v1136_v45  ;;  %v1209_v49 = vpop.permute.xlu1 %1208  ;;  %v1163_v4 = vpop.permute.xlu0 %1162  ;;  %v2068_v10 = vpack.c.bf16 %v1139_v38, %v1137_v56 }
 0x30a   : > { %v1169_v13 = vsel %vm446_vm2, %v1155_v51, %v1163_v4  ;;  %v1173_v21 = vsel %vm446_vm2, %v1163_v4, %v1155_v51  ;;  %v1216_v46 = vsel %vm495_vm3, %v1201_v40, %v1209_v49  ;;  %v1220_v30 = vsel %vm495_vm3, %v1209_v49, %v1201_v40 }
 0x30b   : > { %v3476_v26 = vmul.f32 %v1173_v21, %v2985_v58  ;;  %v3479_v45 = vmul.f32 %v1169_v13, %v2993_v61  ;;  %2069 = vmatprep.subr.bf16.mxu1 %v2068_v10  ;;  %v3494_v50 = vmul.f32 %v1220_v30, %v3030_v43  ;;  %v3497_v49 = vmul.f32 %v1216_v46, %v3032_v44  ;;  %v1181_v44 = vld [vmem:[#allocation12 + $0x68] sm:$0xff] }
 0x30c   : > { %2071 = vmatpush1.bf16.msra.mxu1 %v2070_v54 }
 0x30d   : > { %v1257_v4 = vpop.permute.xlu1 %1256  ;;  %v1211_v63 = vpop.permute.xlu0 %1210 }
 0x30e   : > { %v1217_v61 = vsel %vm495_vm3, %v1203_v15, %v1211_v63  ;;  %v1221_v10 = vsel %vm495_vm3, %v1211_v63, %v1203_v15  ;;  %v1264_v29 = vsel %vm544_vm4, %v1249_v55, %v1257_v4  ;;  %v1268_v40 = vsel %vm544_vm4, %v1257_v4, %v1249_v55 }
 0x30f   : > { %v3500_v37 = vmul.f32 %v1221_v10, %v3026_v41  ;;  %v3503_v38 = vmul.f32 %v1217_v61, %v3028_v42  ;;  %v3518_v52 = vmul.f32 %v1268_v40, %v3065_v23  ;;  %v3521_v53 = vmul.f32 %v1264_v29, %v3067_v24 }
 0x311   : > { %v1305_v43 = vpop.permute.xlu1 %1304  ;;  %v1259_v15 = vpop.permute.xlu0 %1258 }
 0x312   : > { %v1265_v41 = vsel %vm544_vm4, %v1251_v0, %v1259_v15  ;;  %v1269_v42 = vsel %vm544_vm4, %v1259_v15, %v1251_v0  ;;  %v1312_v27 = vsel %vm593_vm5, %v1297_v18, %v1305_v43  ;;  %v1316_v56 = vsel %vm593_vm5, %v1305_v43, %v1297_v18 }
 0x313   : > { %v3524_v55 = vmul.f32 %v1269_v42, %v3061_v19  ;;  %v3527_v39 = vmul.f32 %v1265_v41, %v3063_v20  ;;  %v3542_v54 = vmul.f32 %v1312_v27, %v3100_v8  ;;  %v3545_v13 = vmul.f32 %v1316_v56, %v3102_v9  ;;  %v1132_v56 = vld [vmem:[#allocation12 + $0x20] sm:$0xff] }
 0x315   : > { %v1353_v23 = vpop.permute.xlu1 %1352  ;;  %v1307_v14 = vpop.permute.xlu0 %1306 }
 0x316   : > { %v1313_v19 = vsel %vm593_vm5, %v1299_v28, %v1307_v14  ;;  %v1317_v20 = vsel %vm593_vm5, %v1307_v14, %v1299_v28  ;;  %v1360_v46 = vsel %vm642_vm6, %v3445_v12, %v1353_v23  ;;  %v1364_v28 = vsel %vm642_vm6, %v1353_v23, %v3445_v12  ;;  %v1133_v23 = vld [vmem:[#allocation12 + $0x28] sm:$0xff] }
 0x317   : > { %v3548_v18 = vmul.f32 %v1313_v19, %v3096_v6  ;;  %v3551_v21 = vmul.f32 %v1317_v20, %v3098_v7  ;;  %v3570_v63 = vmul.f32 %v1360_v46, %v3135_v60  ;;  %v3573_v12 = vmul.f32 %v1364_v28, %v3137_v1  ;;  %v1134_v20 = vld [vmem:[#allocation12 + $0x30] sm:$0xff]  ;;  %v1135_v46 = vld [vmem:[#allocation12 + $0x38] sm:$0xff] }
 0x319   : > { %v1355_v30 = vpop.permute.xlu0 %1354  ;;  %v1109_v9 = vpop.permute.xlu1 %1108 }
 0x31a   : > { %v1361_v7 = vsel %vm642_vm6, %v3447_v17, %v1355_v30  ;;  %v1365_v4 = vsel %vm642_vm6, %v1355_v30, %v3447_v17 }
 0x31b   : > { %v3576_v61 = vmul.f32 %v1361_v7, %v3131_v57  ;;  %v3579_v10 = vmul.f32 %v1365_v4, %v3133_v59 }
 0x31d   : > { %v1157_v40 = vpop.permute.xlu1 %1156  ;;  %v1111_v43 = vpop.permute.xlu0 %1110 }
 0x321   : > { %v1205_v15 = vpop.permute.xlu1 %1204  ;;  %v1159_v60 = vpop.permute.xlu0 %1158 }
 0x325   : > { %v3585_v41 = vpop.permute.xlu1 %1252  ;;  %v1207_v1 = vpop.permute.xlu0 %1206 }
 0x329   : > { %v3587_v42 = vpop.permute.xlu1 %1300  ;;  %v3589_v57 = vpop.permute.xlu0 %1254 }
 0x32d   : > { %v1117_v27 = vpop.permute.xlu1 %1116  ;;  %v3591_v59 = vpop.permute.xlu0 %1302 }
 0x32e   : > { %v1122_v14 = vsel %vm397_vm1, %v1109_v9, %v1117_v27  ;;  %v1126_v19 = vsel %vm397_vm1, %v1117_v27, %v1109_v9  ;;  %v1180_v27 = vld [vmem:[#allocation12 + $0x60] sm:$0xff] }
 0x32f   : > { %v1140_v29 = vmul.f32 %v1132_v56, %v1126_v19  ;;  %v1141_v17 = vmul.f32 %v1133_v23, %v1122_v14  ;;  %v1183_v56 = vld [vmem:[#allocation12 + $0x78] sm:$0xff] }
 0x331   : > { %v3597_v28 = vpop.permute.xlu1 %1348  ;;  %v1119_v30 = vpop.permute.xlu0 %1118 }
 0x332   : > { %v1123_v7 = vsel %vm397_vm1, %v1111_v43, %v1119_v30  ;;  %v1127_v4 = vsel %vm397_vm1, %v1119_v30, %v1111_v43  ;;  %v1182_v43 = vld [vmem:[#allocation12 + $0x70] sm:$0xff] }
 0x333   : > { %v1142_v8 = vmul.f32 %v1134_v20, %v1127_v4  ;;  %v1143_v6 = vmul.f32 %v1135_v46, %v1123_v7 }
 0x335   : > { %v2074_v0 = vpack.c.bf16 %v1142_v8, %v1140_v29  ;;  %v1165_v24 = vpop.permute.xlu1 %1164  ;;  %v3603_v51 = vpop.permute.xlu0 %1350  ;;  %v2072_v9 = vpack.c.bf16 %v1143_v6, %v1141_v17  ;;  %v3906_v8 = vpack.c.bf16 %v3479_v45, %v3473_v25 }
 0x336   : > { %v1170_v62 = vsel %vm446_vm2, %v1157_v40, %v1165_v24  ;;  %v1174_v58 = vsel %vm446_vm2, %v1165_v24, %v1157_v40 }
 0x337   : > { %2073 = vmatprep.subr.bf16.mxu1 %v2072_v9  ;;  %v1188_v17 = vmul.f32 %v1180_v27, %v1174_v58  ;;  %v1189_v19 = vmul.f32 %v1181_v44, %v1170_v62  ;;  %v1230_v62 = vld [vmem:[#allocation12 + $0xb0] sm:$0xff]  ;;  %v1231_v58 = vld [vmem:[#allocation12 + $0xb8] sm:$0xff] }
 0x338   : > { %2075 = vmatpush1.bf16.msra.mxu1 %v2074_v0  ;;  %v3907_v0 = vpack.c.bf16 %v3476_v26, %v3470_v22  ;;  %v3908_v22 = vpack.c.bf16 %v3503_v38, %v3497_v49 }
 0x339   : > { %v1213_v23 = vpop.permute.xlu1 %1212  ;;  %v1167_v14 = vpop.permute.xlu0 %1166  ;;  %2077 = vmatprep.subr.bf16.mxu1 %v3906_v8 }
 0x33a   : > { %v1171_v6 = vsel %vm446_vm2, %v1159_v60, %v1167_v14  ;;  %v1175_v29 = vsel %vm446_vm2, %v1167_v14, %v1159_v60  ;;  %v1218_v45 = vsel %vm495_vm3, %v1205_v15, %v1213_v23  ;;  %v1222_v60 = vsel %vm495_vm3, %v1213_v23, %v1205_v15 }
 0x33b   : > { %v1190_v20 = vmul.f32 %v1182_v43, %v1175_v29  ;;  %v1191_v46 = vmul.f32 %v1183_v56, %v1171_v6  ;;  %v1236_v9 = vmul.f32 %v1222_v60, %v3046_v2  ;;  %v1237_v27 = vmul.f32 %v1218_v45, %v3048_v3  ;;  %v1278_v3 = vld [vmem:[#allocation12 + $0xf0] sm:$0xff] }
 0x33c   : > { %2079 = vmatpush1.bf16.msra.mxu1 %v3907_v0  ;;  %v3909_v56 = vpack.c.bf16 %v3500_v37, %v3494_v50  ;;  %v3910_v50 = vpack.c.bf16 %v3527_v39, %v3521_v53  ;;  %v3911_v0 = vpack.c.bf16 %v3524_v55, %v3518_v52  ;;  %v3912_v55 = vpack.c.bf16 %v3551_v21, %v3545_v13 }
 0x33d   : > { %v2082_v24 = vpack.c.bf16 %v1190_v20, %v1188_v17  ;;  %v1261_v40 = vpop.permute.xlu1 %1260  ;;  %v3619_v30 = vpop.permute.xlu0 %1394  ;;  %v2080_v25 = vpack.c.bf16 %v1191_v46, %v1189_v19 }
 0x33e   : > { %v1266_v8 = vsel %vm544_vm4, %v3585_v41, %v1261_v40  ;;  %v1270_v2 = vsel %vm544_vm4, %v1261_v40, %v3585_v41 }
 0x33f   : > { %2081 = vmatprep.subr.bf16.mxu1 %v2080_v25  ;;  %v1284_v19 = vmul.f32 %v1270_v2, %v3081_v47  ;;  %v1285_v41 = vmul.f32 %v1266_v8, %v3083_v48  ;;  %v1326_v48 = vld [vmem:[#allocation12 + $0x130] sm:$0xff]  ;;  %v1327_v25 = vld [vmem:[#allocation12 + $0x138] sm:$0xff]  ;;  %v3916_v2 = vld [vmem:[#allocation19_spill] sm:$0xff] }
 0x340   : > { %2083 = vmatpush1.bf16.msra.mxu1 %v2082_v24 }
 0x341   : > { %v1309_v44 = vpop.permute.xlu1 %1308  ;;  %v1215_v7 = vpop.permute.xlu0 %1214  ;;  %2085 = vmatprep.subr.bf16.mxu1 %v3908_v22  ;;  %v3913_v22 = vpack.c.bf16 %v3548_v18, %v3542_v54 }
 0x342   : > { %v1219_v26 = vsel %vm495_vm3, %v1207_v1, %v1215_v7  ;;  %v1223_v4 = vsel %vm495_vm3, %v1215_v7, %v1207_v1  ;;  %v1279_v1 = vld [vmem:[#allocation12 + $0xf8] sm:$0xff]  ;;  %v1318_v47 = vsel %vm593_vm5, %v1309_v44, %v3587_v42 }
 0x343   : > { %v1238_v15 = vmul.f32 %v1230_v62, %v1223_v4  ;;  %v1239_v43 = vmul.f32 %v1231_v58, %v1219_v26 }
 0x344   : > { %2087 = vmatpush1.bf16.msra.mxu1 %v3909_v56 }
 0x345   : > { %v2090_v23 = vpack.c.bf16 %v1238_v15, %v1236_v9  ;;  %v1357_v14 = vpop.permute.xlu1 %1356  ;;  %v1403_v49 = vpop.permute.xlu0 %1402  ;;  %v2088_v38 = vpack.c.bf16 %v1239_v43, %v1237_v27  ;;  %v3914_v27 = vpack.c.bf16 %v3579_v10, %v3573_v12 }
 0x346   : > { %v1362_v9 = vsel %vm642_vm6, %v3597_v28, %v1357_v14  ;;  %v1413_v54 = vsel %vm691_vm7, %v1403_v49, %v3619_v30 }
 0x347   : > { %2089 = vmatprep.subr.bf16.mxu1 %v2088_v38  ;;  %v1380_v15 = vmul.f32 %v1362_v9, %v3155_v33  ;;  %v1409_v33 = vsel %vm691_vm7, %v3619_v30, %v1403_v49  ;;  %v3915_v38 = vpack.c.bf16 %v3576_v61, %v3570_v63  ;;  %v1427_v8 = vmul.f32 %v1413_v54, %v3174_v5 }
 0x348   : > { %2091 = vmatpush1.bf16.msra.mxu1 %v2090_v23 }
 0x349   : > { %v1393_v6 = vpop.permute.xlu1 %1392  ;;  %v1263_v29 = vpop.permute.xlu0 %1262  ;;  %2093 = vmatprep.subr.bf16.mxu1 %v3910_v50 }
 0x34a   : > { %v1267_v37 = vsel %vm544_vm4, %v3589_v57, %v1263_v29  ;;  %v1271_v17 = vsel %vm544_vm4, %v1263_v29, %v3589_v57  ;;  %v1314_v57 = vsel %vm593_vm5, %v3587_v42, %v1309_v44  ;;  %v1333_v42 = vmul.f32 %v1318_v47, %v3118_v36  ;;  %v3918_v29 = vld [vmem:[#allocation22_spill] sm:$0xff] }
 0x34b   : > { %v1286_v20 = vmul.f32 %v1278_v3, %v1271_v17  ;;  %v1287_v46 = vmul.f32 %v1279_v1, %v1267_v37  ;;  %v1332_v58 = vmul.f32 %v1314_v57, %v3116_v35  ;;  %v1366_v35 = vsel %vm642_vm6, %v1357_v14, %v3597_v28  ;;  %v3919_v37 = vld [vmem:[#allocation23_spill] sm:$0xff]  ;;  %v3921_v57 = vld [vmem:[#allocation25_spill] sm:$0xff] }
 0x34c   : > { %2095 = vmatpush1.bf16.msra.mxu1 %v3911_v0  ;;  %v1381_v23 = vmul.f32 %v1366_v35, %v3157_v34 }
 0x34d   : > { %v2098_v53 = vpack.c.bf16 %v1286_v20, %v1284_v19  ;;  %v1401_v39 = vpop.permute.xlu1 %1400  ;;  %v3657_v24 = vpop.permute.xlu0 %1398  ;;  %v2096_v40 = vpack.c.bf16 %v1287_v46, %v1285_v41 }
 0x34e   : > { %v1412_v36 = vsel %vm691_vm7, %v1401_v39, %v1393_v6  ;;  %v1408_v43 = vsel %vm691_vm7, %v1393_v6, %v1401_v39  ;;  %v3917_v6 = vld [vmem:[#allocation18_spill] sm:$0xff]  ;;  %v3920_v39 = vld [vmem:[#allocation27_spill] sm:$0xff] }
 0x34f   : > { %2097 = vmatprep.subr.bf16.mxu1 %v2096_v40  ;;  %v1425_v14 = vmul.f32 %v1412_v36, %v3178_v11  ;;  %v1426_v30 = vmul.f32 %v1409_v33, %v3917_v6  ;;  %v3926_v36 = vld [vmem:[#allocation30_spill] sm:$0xff] }
 0x350   : > { %2099 = vmatpush1.bf16.msra.mxu1 %v2098_v53  ;;  %v1497_v33 = vld [vmem:[#allocation10 + $0x20] sm:$0xff] }
 0x351   : > { %v1397_v45 = vpop.permute.xlu1 %1396  ;;  %v1311_v52 = vpop.permute.xlu0 %1310  ;;  %2101 = vmatprep.subr.bf16.mxu1 %v3912_v55  ;;  %v2116_v49 = vpack.c.bf16 %v1427_v8, %v1425_v14  ;;  %v1493_v14 = vld [vmem:[#allocation10] sm:$0xff]  ;;  %v1499_v8 = vld [vmem:[#allocation10 + $0x30] sm:$0xff] }
 0x352   : > { %v1315_v60 = vsel %vm593_vm5, %v3591_v59, %v1311_v52  ;;  %v1319_v62 = vsel %vm593_vm5, %v1311_v52, %v3591_v59 }
 0x353   : > { %v1334_v44 = vmul.f32 %v1326_v48, %v1315_v60  ;;  %v1335_v7 = vmul.f32 %v1327_v25, %v1319_v62  ;;  %v3922_v48 = vld [vmem:[#allocation20_spill] sm:$0xff] }
 0x354   : > { %2103 = vmatpush1.bf16.msra.mxu1 %v3913_v22 }
 0x355   : > { %v2106_v13 = vpack.c.bf16 %v1334_v44, %v1332_v58  ;;  %v1405_v21 = vpop.permute.xlu1 %1404  ;;  %v1443_v26 = vpop.permute.xlu0 %1442  ;;  %v2104_v4 = vpack.c.bf16 %v1335_v7, %v1333_v42  ;;  %v3924_v42 = vld [vmem:[#allocation26_spill] sm:$0xff]  ;;  %v3925_v7 = vld [vmem:[#allocation24_spill] sm:$0xff] }
 0x357   : > { %2105 = vmatprep.subr.bf16.mxu1 %v2104_v4 }
 0x358   : > { %2107 = vmatpush1.bf16.msra.mxu1 %v2106_v13 }
 0x359   : > { %v1441_v18 = vpop.permute.xlu1 %1440  ;;  %v1359_v59 = vpop.permute.xlu0 %1358  ;;  %2109 = vmatprep.subr.bf16.mxu1 %v3914_v27  ;;  %v3928_v27 = vld [vmem:[#allocation28_spill] sm:$0xff] }
 0x35a   : > { %v1363_v28 = vsel %vm642_vm6, %v3603_v51, %v1359_v59  ;;  %v1367_v56 = vsel %vm642_vm6, %v1359_v59, %v3603_v51  ;;  %v1424_v51 = vmul.f32 %v1408_v43, %v3916_v2  ;;  %v3929_v43 = vld [vmem:[#allocation29_spill] sm:$0xff] }
 0x35b   : > { %v1382_v12 = vmul.f32 %v1363_v28, %v3151_v31  ;;  %v1383_v10 = vmul.f32 %v1367_v56, %v3153_v32  ;;  %v1410_v31 = vsel %vm691_vm7, %v1397_v45, %v1405_v21  ;;  %v1414_v32 = vsel %vm691_vm7, %v1405_v21, %v1397_v45  ;;  %v3923_v45 = vld [vmem:[#allocation21_spill] sm:$0xff] }
 0x35c   : > { %2111 = vmatpush1.bf16.msra.mxu1 %v3915_v38  ;;  %v2118_v61 = vpack.c.bf16 %v1426_v30, %v1424_v51  ;;  %v1428_v50 = vmul.f32 %v1410_v31, %v3918_v29  ;;  %v1429_v17 = vmul.f32 %v1414_v32, %v3919_v37  ;;  %v1500_v38 = vld [vmem:[#allocation10 + $0x38] sm:$0xff] }
 0x35d   : > { %v2114_v3 = vpack.c.bf16 %v1382_v12, %v1380_v15  ;;  %v1449_v34 = vpop.permute.xlu1 %1448  ;;  %v1451_v1 = vpop.permute.xlu0 %1450  ;;  %v2112_v11 = vpack.c.bf16 %v1383_v10, %v1381_v23  ;;  %v1496_v12 = vld [vmem:[#allocation10 + $0x18] sm:$0xff]  ;;  %v1498_v10 = vld [vmem:[#allocation10 + $0x28] sm:$0xff] }
 0x35e   : > { %v1460_v63 = vsel %vm740_vm8, %v1449_v34, %v1441_v18  ;;  %v1461_v5 = vsel %vm740_vm8, %v1451_v1, %v1443_v26  ;;  %v1456_v20 = vsel %vm740_vm8, %v1441_v18, %v1449_v34  ;;  %v1457_v46 = vsel %vm740_vm8, %v1443_v26, %v1451_v1  ;;  %v3927_v18 = vld [vmem:[#allocation31_spill] sm:$0xff] }
 0x35f   : > { %2113 = vmatprep.subr.bf16.mxu1 %v2112_v11  ;;  %v1473_v40 = vmul.f32 %v1460_v63, %v3920_v39  ;;  %v1475_v47 = vmul.f32 %v1461_v5, %v3921_v57  ;;  %v1472_v44 = vmul.f32 %v1456_v20, %v3924_v42  ;;  %v1474_v22 = vmul.f32 %v1457_v46, %v3925_v7  ;;  %v1796_v11 = vld [vmem:[%s2767_s10 + $0x8] sm:$0xff]  ;;  %v1797_v63 = vld [vmem:[%s2767_s10 + $0x10] sm:$0xff] }
 0x360   : > { %2115 = vmatpush1.bf16.msra.mxu1 %v2114_v3  ;;  %v1795_v3 = vld [vmem:[%s2767_s10] sm:$0xff]  ;;  %v1800_v57 = vld [vmem:[%s2767_s10 + $0x28] sm:$0xff] }
 0x361   : > { %v1445_v19 = vpop.permute.xlu1 %1444  ;;  %v1407_v41 = vpop.permute.xlu0 %1406  ;;  %2117 = vmatprep.subr.bf16.mxu1 %v2116_v49  ;;  %v2124_v13 = vpack.c.bf16 %v1475_v47, %v1473_v40  ;;  %v2126_v4 = vpack.c.bf16 %v1474_v22, %v1472_v44  ;;  %v1802_v44 = vld [vmem:[%s2767_s10 + $0x38] sm:$0xff] }
 0x362   : > { %v1411_v0 = vsel %vm691_vm7, %v3657_v24, %v1407_v41  ;;  %v1415_v53 = vsel %vm691_vm7, %v1407_v41, %v3657_v24 }
 0x363   : > { %v1430_v25 = vmul.f32 %v1411_v0, %v3922_v48  ;;  %v1431_v52 = vmul.f32 %v1415_v53, %v3923_v45  ;;  %v1799_v0 = vld [vmem:[%s2767_s10 + $0x20] sm:$0xff] }
 0x364   : > { %2119 = vmatpush1.bf16.msra.mxu1 %v2118_v61 }
 0x365   : > { %v2122_v55 = vpack.c.bf16 %v1430_v25, %v1428_v50  ;;  %v1453_v60 = vpop.permute.xlu1 %1452  ;;  %v1447_v62 = vpop.permute.xlu0 %1446  ;;  %v2120_v58 = vpack.c.bf16 %v1431_v52, %v1429_v17  ;;  %v1798_v50 = vld [vmem:[%s2767_s10 + $0x18] sm:$0xff] }
 0x366   : > { %v1458_v24 = vsel %vm740_vm8, %v1445_v19, %v1453_v60  ;;  %v1462_v21 = vsel %vm740_vm8, %v1453_v60, %v1445_v19  ;;  %v1801_v60 = vld [vmem:[%s2767_s10 + $0x30] sm:$0xff]  ;;  %s3778_s10 = scalar_lea.hbm %s3832_s7, %s1987_s30 }
 0x367   : > { %2121 = vmatprep.subr.bf16.mxu1 %v2120_v58  ;;  %v1476_v54 = vmul.f32 %v1458_v24, %v3926_v36  ;;  %v1477_v59 = vmul.f32 %v1462_v21, %v3927_v18 }
 0x368   : > { %2123 = vmatpush1.bf16.msra.mxu1 %v2122_v55 }
 0x369   : > { %v1455_v26 = vpop.permute.xlu0 %1454  ;;  %2125 = vmatprep.subr.bf16.mxu1 %v2124_v13 }
 0x36a   : > { %v1459_v9 = vsel %vm740_vm8, %v1447_v62, %v1455_v26  ;;  %v1463_v35 = vsel %vm740_vm8, %v1455_v26, %v1447_v62 }
 0x36b   : > { %v1478_v15 = vmul.f32 %v1459_v9, %v3928_v27  ;;  %v1479_v28 = vmul.f32 %v1463_v35, %v3929_v43 }
 0x36c   : > { %2127 = vmatpush1.bf16.msra.mxu1 %v2126_v4 }
 0x36d   : > { %v2130_v56 = vpack.c.bf16 %v1478_v15, %v1476_v54  ;;  %v2128_v23 = vpack.c.bf16 %v1479_v28, %v1477_v59 }
 0x36f   : > { %2129 = vmatprep.subr.bf16.mxu1 %v2128_v23 }
 0x370   : > { %2131 = vmatpush1.bf16.msra.mxu1 %v2130_v56 }
 0x373   : > { %1743 = vmatmul.mubr.f32.vlgmr.msra.gmra.mrb[0].mxu1 %v1493_v14 }
 0x374   : > { %1748 = vmatprep.mubr.f32.mxu1 %v1496_v12 }
 0x376   : > { %v1770_v2 = vpop.permute.xlu1 %1769 }
 0x377   : > { %1749 = vmatmul.mubr.f32.gmra.mrb[2].mxu1 %v1495_v16 }
 0x378   : > { %1754 = vmatprep.mubr.f32.mxu1 %v1498_v10 }
 0x37a   : > { %v1775_v6 = vpop.permute.xlu0 %1774  ;;  %v1780_v41 = vpop.permute.xlu1 %1779 }
 0x37b   : > { %1755 = vmatmul.mubr.f32.gmra.mrb[4].mxu1 %v1497_v33 }
 0x37c   : > { %1760 = vmatprep.mubr.f32.mxu1 %v1500_v38 }
 0x37e   : > { %v1785_v45 = vpop.permute.xlu0 %1784 }
 0x37f   : > { %1761 = vmatmul.mubr.f32.gmra.mrb[6].mxu1 %v1499_v8 }
 0x446   : > { %v1744_v51 = vpop.f32.mrb[0].mxu1 }
 0x447   : > { %v1787_v34 = vadd.f32 %v1770_v2, %v1744_v51  ;;  %v1746_v1 = vpop.f32.mrb[1].mxu1 }
 0x448   : > { %v1788_v31 = vadd.f32 %v1770_v2, %v1746_v1 }
 0x449   : > { %v1803_v32 = vadd.f32 %v1795_v3, %v1787_v34 }
 0x44a   : > { %v1804_v30 = vadd.f32 %v1796_v11, %v1788_v31  ;;  %v1750_v49 = vpop.f32.mrb[2].mxu1 }
 0x44b   : > { %v1811_v5 = vmax.f32 %v1803_v32, 0.0  ;;  %v1789_v61 = vadd.f32 %v1775_v6, %v1750_v49  ;;  %v1752_v29 = vpop.f32.mrb[3].mxu1 }
 0x44c   : > { %v1812_v37 = vmax.f32 %v1804_v30, 0.0  ;;  %v1790_v17 = vadd.f32 %v1775_v6, %v1752_v29 }
 0x44d   : > { %1819 = vst [vmem:[%s3759_s17] sm:$0xff] %v1811_v5  ;;  %v1805_v19 = vadd.f32 %v1797_v63, %v1789_v61 }
 0x44e   : > { %1820 = vst [vmem:[%s3759_s17 + $0x8] sm:$0xff] %v1812_v37  ;;  %v1806_v20 = vadd.f32 %v1798_v50, %v1790_v17  ;;  %v1756_v46 = vpop.f32.mrb[4].mxu1 }
 0x44f   : > { %v1813_v53 = vmax.f32 %v1805_v19, 0.0  ;;  %v1791_v39 = vadd.f32 %v1780_v41, %v1756_v46  ;;  %v1758_v40 = vpop.f32.mrb[5].mxu1 }
 0x450   : > { %v1814_v47 = vmax.f32 %v1806_v20, 0.0  ;;  %v1792_v48 = vadd.f32 %v1780_v41, %v1758_v40 }
 0x451   : > { %1821 = vst [vmem:[%s3759_s17 + $0x10] sm:$0xff] %v1813_v53  ;;  %v1807_v25 = vadd.f32 %v1799_v0, %v1791_v39 }
 0x452   : > { %1822 = vst [vmem:[%s3759_s17 + $0x18] sm:$0xff] %v1814_v47  ;;  %v1808_v52 = vadd.f32 %v1800_v57, %v1792_v48  ;;  %v1762_v55 = vpop.f32.mrb[6].mxu1 }
 0x453   : > { %v1815_v62 = vmax.f32 %v1807_v25, 0.0  ;;  %v1793_v58 = vadd.f32 %v1785_v45, %v1762_v55  ;;  %v1764_v42 = vpop.f32.mrb[7].mxu1 }
 0x454   : > { %v1816_v7 = vmax.f32 %v1808_v52, 0.0  ;;  %v1794_v22 = vadd.f32 %v1785_v45, %v1764_v42 }
 0x455   : > { %1823 = vst [vmem:[%s3759_s17 + $0x20] sm:$0xff] %v1815_v62  ;;  %v1809_v13 = vadd.f32 %v1801_v60, %v1793_v58 }
 0x456   : > { %1824 = vst [vmem:[%s3759_s17 + $0x28] sm:$0xff] %v1816_v7  ;;  %v1810_v24 = vadd.f32 %v1802_v44, %v1794_v22 }
 0x457   : > { %v1817_v21 = vmax.f32 %v1809_v13, 0.0 }
 0x458   : > { %v1818_v26 = vmax.f32 %v1810_v24, 0.0 }
 0x459   : > { %1825 = vst [vmem:[%s3759_s17 + $0x30] sm:$0xff] %v1817_v21 }
 0x45a   : > { %1826 = vst [vmem:[%s3759_s17 + $0x38] sm:$0xff] %v1818_v26 }
 0x45b   : > { %2407 = shalt.err (!%p2404_p13)
}
 0x45c   : > { %s2408_s22 = scalar_lea.hbm %s3778_s10, 1024  ;;  %s2412_s17 = scalar_lea.hbm %s3832_s7, 2048 }
 0x45d   : > { %p2409_p9 = scmp.ne.s32.totalorder %s3778_s10, %s2408_s22  ;;  %p2413_p6 = scmp.lt.u32.totalorder %s3778_s10, %s3832_s7 }
 0x45e   : > { %p2414_p4 = scmp.lt.u32.totalorder %s2412_s17, %s2408_s22  ;;  %p2416_p10 = scmp.lt.u32.totalorder %s2408_s22, %s3778_s10 }
 0x45f   : > { %p2410_p0 = pnand %p2409_p9, %p2709_p3 }
 0x460   : > { %p2415_p8 = por %p2414_p4, %p2413_p6 }
 0x461   : > { %p2411_p11 = pneg %p2410_p0 }
 0x462   : > { %p2417_p5 = por %p2416_p10, %p2415_p8 }
 0x464   : > { %p2418_p7 = pnand %p2417_p5, %p2411_p11 }
 0x466   : > { %2421 = shalt.err (!%p2418_p7)
}
 0x467   : > { %s2490_s20 = smov 256  }
 0x468   : > { %2166 = dma.vmem_to_hbm [thread:$0]  (%p2709_p3), %s3773_s1, 1024, %s3778_s10, %s1828_s23, %s2490_s20, %s2490_s20, %s2481_s9  }
 0x469 PF: > { %s1856_s14 = sand.u32 1, %s2456_s24   ;;  %p3931_p12 = scmp.ne.s32.totalorder %s3869_s8, 0 }
 0x46a   : > { %p3932_p1 = scmp.ge.s32.totalorder %s2468_s27, 2  ;;  %s1857_s28 = scalar_lea.sflag [#allocation6], %s1856_s14 }
 0x46c   : > { %p2186_p2 = pnand %p3932_p1, %p3931_p12 }
 0x46e   : > { %2451 = dma.done.wait (!%p2186_p2), %s1857_s28, 1024  }
 0x46f   : > { %2453 = vsyncadd (!%p2186_p2), %s1857_s28, 4294966272  ;;  %p22_p13 = scmp.ge.s32.totalorder %s2696_s12, 4   ;;  %s3933_s24 = smov %s2460_s25 }
 0x470   : > { %s3934_s25 = smov %s2464_s26  ;;  %s3935_s26 = smov %s2705_s29 }
 0x471   : > { %s3936_s27 = smov %s2696_s12  ;;  %24 = sbr.rel (!%p22_p13) target bundleno = 9 (0x9), region = 110 }
 0x478   :  { %1862 = vsyncpa [#allocation5], 1 }
 0x479   :  { %1864 = vsyncpa [#allocation5 + $0x1], 1 }
 0x47a   :  { %1865 = vsyncpa [#allocation8], 1 }
 0x47b   :  { %1866 = vsyncpa [#allocation11], 1 }
 0x47c   :  { %1867 = vsyncpa [#allocation6], 1 }
 0x47d   :  { %1869 = vsyncpa [#allocation6 + $0x1], 1 }

</bundles_post_ra>
